<compile_context>
chip_gen: v5e
topology: v5e:2x2
jax: 0.10.0
libtpu: 0.0.40
codegen_flags: <defaults>
</compile_context>

<pallas_src>
import functools

import jax
import jax.numpy as jnp
from jax import lax
from jax.experimental import pallas as pl
from jax.experimental.pallas import tpu as pltpu

LN_EPS = 1e-5
_LANE = 128
_SUBLANE = 8
_MXU_M = 256          # MXU M granularity (v6e/v7x); also a multiple of v5e's 128
_MIB = 1024 * 1024


def _round_up(x, m):
    return (x + m - 1) // m * m


def _padded_bytes(rows, cols, itemsize):
    """VMEM footprint of a (rows, cols) block after (8, 128) tile padding."""
    return _round_up(rows, _SUBLANE) * _round_up(cols, _LANE) * itemsize


def _vmem_capacity_bytes():
    # Narrow, documented capability query; falls back to a conservative
    # (v7x-sized) capacity so the derived budgets are always safe.
    try:
        return int(pltpu.get_tpu_info().vmem_capacity_bytes)
    except Exception:
        return 64 * _MIB


def patch_expansion_kernel(x_ref, wexp_ref, wconv_ref, wmean_ref, sel_ref,
                           e1_ref, e2_ref, bias_ref, out_ref, *,
                           inv_c, cp, p2, fuse_conv, compute_dtype):
    """Fused expand -> per-sub-token LayerNorm -> 1x1 conv.

    x_ref     : (TM, Cp)        token tile (compute dtype, Cp = C padded to 128)
    wexp_ref  : (Cp, P2*Cp)     expand weight, per-sub-token blocks of width Cp
    wconv_ref : (P2*Cp, P2*OC)  block-diag gamma-folded conv weight (fused path)
                or (Cp, OC)     shared gamma-folded conv weight (per-sub-token path)
    wmean_ref : (Cp, SP)        mean folded into the expand weight (mean = x @ wmean)
    sel_ref   : (P2*Cp, SP)     exact 0/1 per-sub-token selector for sum-of-squares
    e1_ref    : (SP, P2*OC)     lane broadcast: ones blocks
    e2_ref    : (SP, P2*OC)     lane broadcast: colsum(gamma*Wconv) blocks
    bias_ref  : (1, P2*OC)      beta @ Wconv, tiled per sub-token (f32)
    out_ref   : (TM, P2*OC)     sub-token outputs packed along the lane dim
    """
    x = x_ref[...]

    # 1) expand: (TM, Cp) @ (Cp, P2*Cp).  Dominant matmul, f32 accumulation.
    e = jnp.dot(x, wexp_ref[...], preferred_element_type=jnp.float32)
    ec = e.astype(compute_dtype)

    # 2) all P2 1x1 convs (gamma pre-folded into the weight).
    if fuse_conv:
        ybig = jnp.dot(ec, wconv_ref[...], preferred_element_type=jnp.float32)
    else:
        w = wconv_ref[...]
        ybig = jnp.concatenate(
            [jnp.dot(ec[:, j * cp:(j + 1) * cp], w,
                     preferred_element_type=jnp.float32) for j in range(p2)],
            axis=-1)

    # 3) LayerNorm statistics per sub-token.  The mean is folded into the
    #    expand weight (cheap K=Cp matmul straight from x); the second moment
    #    uses an exact 0/1 selector in the compute dtype + a VPU 1/C rescale.
    mean = jnp.dot(x, wmean_ref[...], preferred_element_type=jnp.float32)
    msum = jnp.dot((e * e).astype(compute_dtype), sel_ref[...],
                   preferred_element_type=jnp.float32)
    var = jnp.maximum(msum * inv_c - mean * mean, 0.0)   # clamp: no NaN rsqrt
    rstd = lax.rsqrt(var + LN_EPS)                       # (TM, SP), f32

    # 4) broadcast the per-sub-token scalars across the OC lanes with tiny
    #    compute-dtype matmuls, then a single lane-wide combine + ONE store:
    #      y_j = rstd_j * (sub_j @ (gamma*W)) - (rstd_j*mean_j)*colsum + beta@W
    scale = jnp.dot(rstd.astype(compute_dtype), e1_ref[...],
                    preferred_element_type=jnp.float32)
    shift = jnp.dot((rstd * mean).astype(compute_dtype), e2_ref[...],
                    preferred_element_type=jnp.float32)
    out_ref[...] = (scale * ybig - shift + bias_ref[...]).astype(out_ref.dtype)


def _auto_tile(n_tokens, cp, p2cp, wo_pad, in_item, out_item, c_item,
               const_bytes, budget, tm_cap):
    """MXU-aligned token tile that fits the VMEM budget with >= ~8 grid steps."""
    if n_tokens <= _MXU_M:
        # Tiny problem: single grid step; 16-row alignment keeps bf16 sublane
        # packing happy.
        return int(_round_up(max(n_tokens, 16), 16))
    tm_vmem = _MXU_M
    cand = _MXU_M
    while cand <= tm_cap:
        need = (const_bytes
                + 2 * cand * cp * in_item            # x tile, double-buffered
                + 2 * cand * wo_pad * out_item       # out tile, double-buffered
                + cand * p2cp * (4 + 2 * c_item)     # e (f32) + compute-dtype copies
                + 8 * cand * _LANE * 4)              # stats / combine temporaries
        if need > budget:
            break
        tm_vmem = cand
        cand *= 2
    # >= ~8 grid steps: >= 4 pipelined steps per TensorCore on dual-core parts
    # (v7x) and enough in-flight steps on single-core parts to overlap the x
    # load and the output writeback.
    tm_steps = max(_MXU_M, _round_up(pl.cdiv(n_tokens, 8), _MXU_M))
    return int(min(tm_vmem, tm_steps))


@functools.partial(
    jax.jit,
    static_argnames=("dim_scale", "tm", "compute_dtype", "out_dtype",
                     "vmem_limit_bytes", "fuse_conv"))
def _patch_expansion_impl(x, w_expand, gamma, beta, w_conv, *, dim_scale, tm,
                          compute_dtype, out_dtype, vmem_limit_bytes,
                          fuse_conv):
    B, H, W, C = x.shape
    P = dim_scale
    P2 = P * P
    OC = w_conv.shape[0]
    Wo = P2 * OC
    f32 = jnp.float32
    Cp = _round_up(C, _LANE)          # lane-align the channel dim (zero pad)
    SP = _round_up(P2, _LANE)         # lane-align the per-sub-token stats dim
    wconv2d = w_conv.reshape(OC, C).astype(f32)

    # ---- fold LayerNorm mean/affine + 1x1 conv into constants (in f32) ----
    eye = jnp.eye(P2, dtype=f32)
    wexp_t = jnp.transpose(w_expand.astype(f32)).reshape(C, P2, C)
    wexp_p = jnp.zeros((Cp, P2, Cp), f32).at[:C, :, :C].set(wexp_t)
    # mean folded into the expand weight: mean_j = x @ wmean[:, j]
    wmean = jnp.sum(wexp_p, axis=-1) / C                           # (Cp, P2)
    wmean = jnp.pad(wmean, ((0, 0), (0, SP - P2))).astype(compute_dtype)
    wexp_p = wexp_p.reshape(Cp, P2 * Cp).astype(compute_dtype)
    # gamma-folded conv weight
    wg = gamma.astype(f32)[:, None] * jnp.transpose(wconv2d)       # (C, OC)
    wg_p = jnp.zeros((Cp, OC), f32).at[:C, :].set(wg)
    if fuse_conv:
        wconv_k = jnp.einsum('jk,co->jcko', eye, wg_p).reshape(P2 * Cp, Wo)
    else:
        wconv_k = wg_p
    wconv_k = wconv_k.astype(compute_dtype)
    # exact 0/1 selector for the per-sub-token sum of squares
    sel = jnp.einsum('jk,c->jck', eye, jnp.ones((Cp,), f32)).reshape(P2 * Cp, P2)
    sel = jnp.pad(sel, ((0, 0), (0, SP - P2))).astype(compute_dtype)
    # lane-broadcast constants and the folded bias
    colsum = jnp.sum(wg, axis=0)                                   # (OC,)
    bias = beta.astype(f32) @ jnp.transpose(wconv2d)               # (OC,)
    e1 = jnp.einsum('jk,o->jko', eye, jnp.ones((OC,), f32)).reshape(P2, Wo)
    e1 = jnp.pad(e1, ((0, SP - P2), (0, 0))).astype(compute_dtype)
    e2 = jnp.einsum('jk,o->jko', eye, colsum).reshape(P2, Wo)
    e2 = jnp.pad(e2, ((0, SP - P2), (0, 0))).astype(compute_dtype)
    bias2 = jnp.tile(bias, (P2,)).reshape(1, Wo)

    # ---- tokens: flatten, lane-pad C, pad N to a tile multiple ----
    N = B * H * W
    Np = _round_up(N, tm)
    x_flat = x.reshape(N, C).astype(compute_dtype)
    x_p = jnp.pad(x_flat, ((0, Np - N), (0, Cp - C)))

    # ---- cost hint for the XLA scheduler ----
    c_item = jnp.dtype(compute_dtype).itemsize
    flops = 2 * Np * Cp * (P2 * Cp)              # expand
    flops += 2 * Np * (P2 * Cp) * Wo             # fused 1x1 conv
    flops += 2 * Np * Cp * SP                    # folded mean
    flops += 2 * Np * (P2 * Cp) * SP             # sum of squares
    flops += 2 * 2 * Np * SP * Wo                # rstd / shift broadcasts
    const_bytes = sum(int(a.size) * a.dtype.itemsize
                      for a in (wexp_p, wconv_k, wmean, sel, e1, e2, bias2))
    bytes_accessed = (int(x_p.size) * c_item + const_bytes
                      + Np * Wo * jnp.dtype(out_dtype).itemsize)
    cost = pl.CostEstimate(flops=int(flops), transcendentals=int(Np * SP),
                           bytes_accessed=int(bytes_accessed))

    kernel = functools.partial(patch_expansion_kernel, inv_c=1.0 / C, cp=Cp,
                               p2=P2, fuse_conv=fuse_conv,
                               compute_dtype=compute_dtype)
    const_shapes = (wexp_p.shape, wconv_k.shape, wmean.shape, sel.shape,
                    e1.shape, e2.shape, bias2.shape)
    out_flat = pl.pallas_call(
        kernel,
        out_shape=jax.ShapeDtypeStruct((Np, Wo), out_dtype),
        grid_spec=pltpu.PrefetchScalarGridSpec(
            num_scalar_prefetch=0,
            grid=(Np // tm,),
            in_specs=[pl.BlockSpec((tm, Cp), lambda i: (i, 0))]
                     + [pl.BlockSpec(s, lambda i: (0, 0)) for s in const_shapes],
            out_specs=pl.BlockSpec((tm, Wo), lambda i: (i, 0)),
        ),
        compiler_params=pltpu.CompilerParams(
            dimension_semantics=("parallel",),
            vmem_limit_bytes=int(vmem_limit_bytes)),
        cost_estimate=cost,
    )(x_p, wexp_p, wconv_k, wmean, sel, e1, e2, bias2)

    # Glue: drop padding, unpack sub-tokens j = p1*P + p2 into the spatial
    # grid, then NCHW.  Pure reshape/transpose, fused by XLA (inside the jit).
    out = out_flat[:N].reshape(B, H, W, P, P, OC)
    out = out.transpose(0, 1, 3, 2, 4, 5).reshape(B, H * P, W * P, OC)
    return out.transpose(0, 3, 1, 2)


def patch_expansion(x, w_expand, gamma, beta, w_conv, *, dim_scale, tm=None,
                    compute_dtype=jnp.bfloat16, out_dtype=None,
                    vmem_limit_bytes=None):
    """x: (B, H, W, embed_dim).  Returns NCHW (B, out_chans, H*P, W*P)."""
    B, H, W, C = x.shape
    P2 = dim_scale * dim_scale
    assert w_expand.shape == (P2 * C, C)          # torch Linear: (out, in)
    OC = w_conv.shape[0]                          # torch Conv2d: (out, in, 1, 1)
    Wo = P2 * OC
    Cp = _round_up(C, _LANE)
    SP = _round_up(P2, _LANE)
    N = B * H * W

    compute_dtype = jnp.dtype(compute_dtype)
    out_dtype = jnp.dtype(x.dtype if out_dtype is None else out_dtype)
    c_item = compute_dtype.itemsize
    out_item = out_dtype.itemsize

    # Generation-aware VMEM budget: v7x has 64 MiB/TensorCore, v5e/v6e 128 MiB.
    if vmem_limit_bytes is None:
        cap = _vmem_capacity_bytes()
        if cap <= 96 * _MIB:
            vmem_limit_bytes, tm_cap = 40 * _MIB, 2048
        else:
            vmem_limit_bytes, tm_cap = 80 * _MIB, 4096
    else:
        vmem_limit_bytes, tm_cap = int(vmem_limit_bytes), 4096

    # Fused block-diagonal conv weight only while it stays cheap in VMEM;
    # otherwise P2 small (Cp, OC) matmuls on contiguous lane slices of e.
    fuse_conv = _padded_bytes(P2 * Cp, Wo, c_item) <= 8 * _MIB

    if tm is None:
        conv_rows = P2 * Cp if fuse_conv else Cp
        conv_cols = Wo if fuse_conv else OC
        const_bytes = 2 * (                       # constants are double-buffered
            _padded_bytes(Cp, P2 * Cp, c_item)
            + _padded_bytes(conv_rows, conv_cols, c_item)
            + _padded_bytes(Cp, SP, c_item)
            + _padded_bytes(P2 * Cp, SP, c_item)
            + 2 * _padded_bytes(SP, Wo, c_item)
            + _padded_bytes(1, Wo, 4))
        tm = _auto_tile(N, Cp, P2 * Cp, _round_up(Wo, _LANE),
                        c_item, out_item, c_item,
                        const_bytes, vmem_limit_bytes * 3 // 4, tm_cap)
    tm = max(16, _round_up(int(tm), 16))          # bf16 sublane packing

    return _patch_expansion_impl(
        x, w_expand, gamma, beta, w_conv, dim_scale=dim_scale, tm=tm,
        compute_dtype=compute_dtype, out_dtype=out_dtype,
        vmem_limit_bytes=vmem_limit_bytes, fuse_conv=fuse_conv)


def patch_expansion_reference(x, w_expand, gamma, beta, w_conv, *, dim_scale):
    """Pure-JAX f32 reference mirroring the PyTorch forward exactly."""
    B, H, W, C = x.shape
    P = dim_scale
    OC = w_conv.shape[0]
    e = jnp.einsum('bhwc,oc->bhwo', x, w_expand)                 # Linear, no bias
    e = e.reshape(B, H, W, P, P, C)                              # (p1 p2 c) split
    e = e.transpose(0, 1, 3, 2, 4, 5).reshape(B, H * P, W * P, C)
    mean = jnp.mean(e, axis=-1, keepdims=True)
    var = jnp.mean((e - mean) ** 2, axis=-1, keepdims=True)
    ln = (e - mean) / jnp.sqrt(var + LN_EPS) * gamma + beta
    y = jnp.einsum('bhwc,oc->bhwo', ln, w_conv.reshape(OC, C))   # 1x1 conv
    return y.transpose(0, 3, 1, 2)                               # NCHW


if __name__ == "__main__":
    # Small, module-consistent shapes: input is (B, H, W, embed_dim).
    B, H, W = 2, 8, 8
    embed_dim = 32
    dim_scale = 2
    out_chans = 4

    key = jax.random.PRNGKey(0)
    kx, kw1, kg, kb, kw2 = jax.random.split(key, 5)

    x = jax.random.normal(kx, (B, H, W, embed_dim), dtype=jnp.float32)
    # nn.Linear(embed_dim, dim_scale**2 * embed_dim, bias=False) -> (out, in)
    w_expand = 0.05 * jax.random.normal(
        kw1, (dim_scale ** 2 * embed_dim, embed_dim), dtype=jnp.float32)
    # nn.LayerNorm(embed_dim) affine params
    gamma = 1.0 + 0.05 * jax.random.normal(kg, (embed_dim,), dtype=jnp.float32)
    beta = 0.05 * jax.random.normal(kb, (embed_dim,), dtype=jnp.float32)
    # nn.Conv2d(embed_dim, out_chans, kernel_size=1, bias=False) -> (out, in, 1, 1)
    w_conv = 0.05 * jax.random.normal(
        kw2, (out_chans, embed_dim, 1, 1), dtype=jnp.float32)

    ref = patch_expansion_reference(x, w_expand, gamma, beta, w_conv,
                                    dim_scale=dim_scale)

    # 1) f32 MXU-operand path: validates the fused/folded algebra tightly.
    out_f32 = jax.block_until_ready(
        patch_expansion(x, w_expand, gamma, beta, w_conv,
                        dim_scale=dim_scale, compute_dtype=jnp.float32))
    assert out_f32.shape == (B, out_chans, H * dim_scale, W * dim_scale)
    assert jnp.allclose(out_f32, ref, atol=1e-4, rtol=1e-4), \
        float(jnp.max(jnp.abs(out_f32 - ref)))

    # 2) default bf16 MXU-operand path (f32 accumulation + f32 LN statistics);
    #    looser tolerance only because matmul operands are bf16-rounded.
    out_bf16 = jax.block_until_ready(
        patch_expansion(x, w_expand, gamma, beta, w_conv,
                        dim_scale=dim_scale))
    assert out_bf16.shape == (B, out_chans, H * dim_scale, W * dim_scale)
    assert jnp.allclose(out_bf16, ref, atol=5e-2, rtol=5e-2), \
        float(jnp.max(jnp.abs(out_bf16 - ref)))

    print("KERNEL_OK")
</pallas_src>

<mosaic_0001>
module attributes {stable_mosaic.version = 11 : i64} {
  func.func @patch_expansion_kernel(%arg0: i32, %arg1: memref<128x128xf32, #tpu.memory_space<vmem>>, %arg2: memref<128x512xf32, #tpu.memory_space<vmem>>, %arg3: memref<512x16xf32, #tpu.memory_space<vmem>>, %arg4: memref<128x128xf32, #tpu.memory_space<vmem>>, %arg5: memref<512x128xf32, #tpu.memory_space<vmem>>, %arg6: memref<128x16xf32, #tpu.memory_space<vmem>>, %arg7: memref<128x16xf32, #tpu.memory_space<vmem>>, %arg8: memref<1x16xf32, #tpu.memory_space<vmem>>, %arg9: memref<128x16xf32, #tpu.memory_space<vmem>>) attributes {dimension_semantics = [#tpu.dimension_semantics<parallel>], iteration_bounds = array<i64: 1>, scalar_prefetch = 0 : i64, scratch_operands = 0 : i64, tpu.core_type = #tpu.core_type<tc>, window_params = [{transform_indices = @transform_0, window_bounds = array<i64: 128, 128>}, {pipeline_mode = #tpu.pipeline_mode<synchronous>, transform_indices = @transform_1, window_bounds = array<i64: 128, 512>}, {pipeline_mode = #tpu.pipeline_mode<synchronous>, transform_indices = @transform_2, window_bounds = array<i64: 512, 16>}, {pipeline_mode = #tpu.pipeline_mode<synchronous>, transform_indices = @transform_3, window_bounds = array<i64: 128, 128>}, {pipeline_mode = #tpu.pipeline_mode<synchronous>, transform_indices = @transform_4, window_bounds = array<i64: 512, 128>}, {pipeline_mode = #tpu.pipeline_mode<synchronous>, transform_indices = @transform_5, window_bounds = array<i64: 128, 16>}, {pipeline_mode = #tpu.pipeline_mode<synchronous>, transform_indices = @transform_6, window_bounds = array<i64: 128, 16>}, {pipeline_mode = #tpu.pipeline_mode<synchronous>, transform_indices = @transform_7, window_bounds = array<i64: 1, 16>}, {transform_indices = @transform_8, window_bounds = array<i64: 128, 16>}]} {
    %c0 = arith.constant 0 : index
    %c0_0 = arith.constant 0 : index
    %0 = vector.load %arg1[%c0, %c0_0] : memref<128x128xf32, #tpu.memory_space<vmem>>, vector<128x128xf32>
    %c0_1 = arith.constant 0 : index
    %c0_2 = arith.constant 0 : index
    %1 = vector.load %arg2[%c0_1, %c0_2] : memref<128x512xf32, #tpu.memory_space<vmem>>, vector<128x512xf32>
    %cst = arith.constant dense<0.000000e+00> : vector<128x512xf32>
    %2 = tpu.matmul %0, %1, %cst {dimension_numbers = #tpu.dot_dimension_numbers<[1], [0], [0], [1], [0, 0, 1, 1], [], []>} : vector<128x128xf32>, vector<128x512xf32>, vector<128x512xf32> -> vector<128x512xf32>
    %c0_3 = arith.constant 0 : index
    %c0_4 = arith.constant 0 : index
    %3 = vector.load %arg3[%c0_3, %c0_4] : memref<512x16xf32, #tpu.memory_space<vmem>>, vector<512x16xf32>
    %cst_5 = arith.constant dense<0.000000e+00> : vector<128x16xf32>
    %4 = tpu.matmul %2, %3, %cst_5 {dimension_numbers = #tpu.dot_dimension_numbers<[1], [0], [0], [1], [0, 0, 1, 1], [], []>} : vector<128x512xf32>, vector<512x16xf32>, vector<128x16xf32> -> vector<128x16xf32>
    %c0_6 = arith.constant 0 : index
    %c0_7 = arith.constant 0 : index
    %5 = vector.load %arg4[%c0_6, %c0_7] : memref<128x128xf32, #tpu.memory_space<vmem>>, vector<128x128xf32>
    %cst_8 = arith.constant dense<0.000000e+00> : vector<128x128xf32>
    %6 = tpu.matmul %0, %5, %cst_8 {dimension_numbers = #tpu.dot_dimension_numbers<[1], [0], [0], [1], [0, 0, 1, 1], [], []>} : vector<128x128xf32>, vector<128x128xf32>, vector<128x128xf32> -> vector<128x128xf32>
    %7 = arith.mulf %2, %2 : vector<128x512xf32>
    %c0_9 = arith.constant 0 : index
    %c0_10 = arith.constant 0 : index
    %8 = vector.load %arg5[%c0_9, %c0_10] : memref<512x128xf32, #tpu.memory_space<vmem>>, vector<512x128xf32>
    %cst_11 = arith.constant dense<0.000000e+00> : vector<128x128xf32>
    %9 = tpu.matmul %7, %8, %cst_11 {dimension_numbers = #tpu.dot_dimension_numbers<[1], [0], [0], [1], [0, 0, 1, 1], [], []>} : vector<128x512xf32>, vector<512x128xf32>, vector<128x128xf32> -> vector<128x128xf32>
    %cst_12 = arith.constant 3.125000e-02 : f32
    %10 = vector.broadcast %cst_12 : f32 to vector<128x128xf32>
    %11 = arith.mulf %9, %10 : vector<128x128xf32>
    %12 = arith.mulf %6, %6 : vector<128x128xf32>
    %13 = arith.subf %11, %12 : vector<128x128xf32>
    %cst_13 = arith.constant 0.000000e+00 : f32
    %14 = vector.broadcast %cst_13 : f32 to vector<128x128xf32>
    %15 = arith.maximumf %13, %14 : vector<128x128xf32>
    %cst_14 = arith.constant 9.99999974E-6 : f32
    %16 = vector.broadcast %cst_14 : f32 to vector<128x128xf32>
    %17 = arith.addf %15, %16 : vector<128x128xf32>
    %18 = math.rsqrt %17 : vector<128x128xf32>
    %c0_15 = arith.constant 0 : index
    %c0_16 = arith.constant 0 : index
    %19 = vector.load %arg6[%c0_15, %c0_16] : memref<128x16xf32, #tpu.memory_space<vmem>>, vector<128x16xf32>
    %cst_17 = arith.constant dense<0.000000e+00> : vector<128x16xf32>
    %20 = tpu.matmul %18, %19, %cst_17 {dimension_numbers = #tpu.dot_dimension_numbers<[1], [0], [0], [1], [0, 0, 1, 1], [], []>} : vector<128x128xf32>, vector<128x16xf32>, vector<128x16xf32> -> vector<128x16xf32>
    %21 = arith.mulf %18, %6 : vector<128x128xf32>
    %c0_18 = arith.constant 0 : index
    %c0_19 = arith.constant 0 : index
    %22 = vector.load %arg7[%c0_18, %c0_19] : memref<128x16xf32, #tpu.memory_space<vmem>>, vector<128x16xf32>
    %cst_20 = arith.constant dense<0.000000e+00> : vector<128x16xf32>
    %23 = tpu.matmul %21, %22, %cst_20 {dimension_numbers = #tpu.dot_dimension_numbers<[1], [0], [0], [1], [0, 0, 1, 1], [], []>} : vector<128x128xf32>, vector<128x16xf32>, vector<128x16xf32> -> vector<128x16xf32>
    %24 = arith.mulf %20, %4 : vector<128x16xf32>
    %25 = arith.subf %24, %23 : vector<128x16xf32>
    %c0_21 = arith.constant 0 : index
    %c0_22 = arith.constant 0 : index
    %26 = vector.load %arg8[%c0_21, %c0_22] : memref<1x16xf32, #tpu.memory_space<vmem>>, vector<1x16xf32>
    %27 = vector.broadcast %26 : vector<1x16xf32> to vector<128x16xf32>
    %28 = arith.addf %25, %27 : vector<128x16xf32>
    %c0_23 = arith.constant 0 : index
    %c0_24 = arith.constant 0 : index
    %29 = vector.load %arg9[%c0_23, %c0_24] : memref<128x16xf32, #tpu.memory_space<vmem>>, vector<128x16xf32>
    tpu.vector_store %arg9[%c0_23, %c0_24], %28 {strides = array<i32>} : memref<128x16xf32, #tpu.memory_space<vmem>>, vector<128x16xf32>,
    return
  }
  func.func @transform_0(%arg0: i32) -> (i32, i32) {
    %c0_i32 = arith.constant 0 : i32
    %c0_i32_0 = arith.constant 0 : i32
    return %arg0, %c0_i32 : i32, i32
  }
  func.func @transform_1(%arg0: i32) -> (i32, i32) {
    %c0_i32 = arith.constant 0 : i32
    %c0_i32_0 = arith.constant 0 : i32
    %c0_i32_1 = arith.constant 0 : i32
    return %c0_i32, %c0_i32_0 : i32, i32
  }
  func.func @transform_2(%arg0: i32) -> (i32, i32) {
    %c0_i32 = arith.constant 0 : i32
    %c0_i32_0 = arith.constant 0 : i32
    %c0_i32_1 = arith.constant 0 : i32
    return %c0_i32, %c0_i32_0 : i32, i32
  }
  func.func @transform_3(%arg0: i32) -> (i32, i32) {
    %c0_i32 = arith.constant 0 : i32
    %c0_i32_0 = arith.constant 0 : i32
    %c0_i32_1 = arith.constant 0 : i32
    return %c0_i32, %c0_i32_0 : i32, i32
  }
  func.func @transform_4(%arg0: i32) -> (i32, i32) {
    %c0_i32 = arith.constant 0 : i32
    %c0_i32_0 = arith.constant 0 : i32
    %c0_i32_1 = arith.constant 0 : i32
    return %c0_i32, %c0_i32_0 : i32, i32
  }
  func.func @transform_5(%arg0: i32) -> (i32, i32) {
    %c0_i32 = arith.constant 0 : i32
    %c0_i32_0 = arith.constant 0 : i32
    %c0_i32_1 = arith.constant 0 : i32
    return %c0_i32, %c0_i32_0 : i32, i32
  }
  func.func @transform_6(%arg0: i32) -> (i32, i32) {
    %c0_i32 = arith.constant 0 : i32
    %c0_i32_0 = arith.constant 0 : i32
    %c0_i32_1 = arith.constant 0 : i32
    return %c0_i32, %c0_i32_0 : i32, i32
  }
  func.func @transform_7(%arg0: i32) -> (i32, i32) {
    %c0_i32 = arith.constant 0 : i32
    %c0_i32_0 = arith.constant 0 : i32
    %c0_i32_1 = arith.constant 0 : i32
    return %c0_i32, %c0_i32_0 : i32, i32
  }
  func.func @transform_8(%arg0: i32) -> (i32, i32) {
    %c0_i32 = arith.constant 0 : i32
    %c0_i32_0 = arith.constant 0 : i32
    return %arg0, %c0_i32 : i32, i32
  }
}

</mosaic_0001>

<bundles_post_ra>
// kernel: tile.8
= control target key start
LH: loop header
LB: loop body
LE: loop exit
PB: predicated region body
PF: predicated region fallthrough
CT: control target
= control target key end

     0   :  { %s22_s0 = inlined_call_operand.vmem [shape: f32[4], index: 0, kind: input, shape index: {}]   ;;  %s23_s1 = inlined_call_operand.vmem [shape: f32[4,4], index: 1, kind: output, shape index: {}]  }
   0x1   :  { %v4_v0 = vld [vmem:[%s22_s0] ss:$0 sm:$0xff] }
   0x2   :  { %5 = vst [vmem:[%s23_s1] sm:$0xf] %v4_v0 }

// kernel: tile.9
= control target key start
LH: loop header
LB: loop body
LE: loop exit
PB: predicated region body
PF: predicated region fallthrough
CT: control target
= control target key end

     0   :  { %s37_s8 = smov 4   ;;  %s38_s9 = smov 8   ;;  %vm7_vm0 = vcmask 31744   ;;  %vm13_vm1 = vcmask 130144   ;;  %vm19_vm2 = vcmask 97344   ;;  %vm25_vm3 = vcmask 64544   ;;  %s55_s0 = inlined_call_operand.vmem [shape: f32[4,4], index: 0, kind: input, shape index: {}]   ;;  %s56_s1 = inlined_call_operand.vmem [shape: f32[1,16], index: 1, kind: output, shape index: {}]  }
   0x1   :  { %v4_v0 = vld [vmem:[%s55_s0] sm:$0xf]  ;;  %s36_s0 = smov 12  }
   0x2   :  { %5 = vst [vmem:[#allocation1] sm:$0xf] %v4_v0 }
   0x9   :  { %v10_v1 = vld [vmem:[#allocation1 + $0x3] sm:$0x1]   ;;  %v22_v2 = vld [vmem:[#allocation1 + $0x1] sm:$0x1]   ;;  %v16_v3 = vld [vmem:[#allocation1 + $0x2] sm:$0x1]  }
   0xa   :  { %11 = vrot.lane.b32.xlu0 %v10_v1, %s36_s0  ;;  %23 = vrot.lane.b32.xlu1 %v22_v2, %s37_s8  ;;  %v6_v4 = vld [vmem:[#allocation1] sm:$0x1]  }
   0xb   :  { %8 = vst.msk [vmem:[#allocation0] sm:$0x1] %vm7_vm0, %v6_v4  }
  0x12   :  { %17 = vrot.lane.b32.xlu0 %v16_v3, %s38_s9 }
  0x7c   :  { %v12_v5 = vpop.permute.xlu0 %11   ;;  %v24_v6 = vpop.permute.xlu1 %23  }
  0x7d   :  { %14 = vst.msk [vmem:[#allocation0] sm:$0x1] %vm13_vm1, %v12_v5  }
  0x84   :  { %v18_v7 = vpop.permute.xlu0 %17  }
  0x85   :  { %20 = vst.msk [vmem:[#allocation0] sm:$0x1] %vm19_vm2, %v18_v7  }
  0x86   :  { %26 = vst.msk [vmem:[#allocation0] sm:$0x1] %vm25_vm3, %v24_v6  }
  0x8d   :  { %v29_v8 = vld [vmem:[#allocation0] sm:$0x1] }
  0x8e   :  { %32 = vst [vmem:[%s56_s1] sm:$0x1] %v29_v8 }

// kernel: _patch_expansion_impl.1
= control target key start
LH: loop header
LB: loop body
LE: loop exit
PB: predicated region body
PF: predicated region fallthrough
CT: control target
= control target key end

     0   :  { %s3387_s1 = inlined_call_operand.vmem [shape: f32[128,512], index: 1, kind: input, shape index: {}]   ;;  %s3388_s0 = inlined_call_operand.vmem [shape: f32[128,128], index: 0, kind: input, shape index: {}]   ;;  %s3389_s2 = inlined_call_operand.vmem [shape: f32[512,16], index: 2, kind: input, shape index: {}]   ;;  %s3390_s3 = inlined_call_operand.vmem [shape: f32[128,128], index: 3, kind: input, shape index: {}]   ;;  %s3391_s4 = inlined_call_operand.vmem [shape: f32[512,128], index: 4, kind: input, shape index: {}]   ;;  %s3392_s6 = inlined_call_operand.vmem [shape: f32[128,16], index: 6, kind: input, shape index: {}]   ;;  %s3393_s5 = inlined_call_operand.vmem [shape: f32[128,16], index: 5, kind: input, shape index: {}]   ;;  %s3394_s7 = inlined_call_operand.vmem [shape: f32[1,16], index: 7, kind: input, shape index: {}]   ;;  %s3395_s8 = inlined_call_operand.vmem [shape: f32[128,16], index: 8, kind: output, shape index: {}]  }
   0x1   :  { %v105_v0 = vld [vmem:[%s3387_s1 + $0x1e0] sm:$0xff]  ;;  %v1809_v5 = vld [vmem:[%s3387_s1 + $0x1e8] sm:$0xff]  ;;  %v108_v30 = vld [vmem:[%s3387_s1 + $0x1f8] sm:$0xff] }
   0x2   :  { %v101_v1 = vld [vmem:[%s3387_s1 + $0x1c0] sm:$0xff]  ;;  %109 = vmatpush.msra.mxu0 %v105_v0  ;;  %1653 = vmatpush.msra.mxu3 %v105_v0  ;;  %v1818_v7 = vld [vmem:[%s3387_s1 + $0x1c8] sm:$0xff]  ;;  %v104_v31 = vld [vmem:[%s3387_s1 + $0x1d8] sm:$0xff] }
   0x3   :  { %v97_v2 = vld [vmem:[%s3387_s1 + $0x1a0] sm:$0xff]  ;;  %1669 = vmatpush.msra.mxu1 %v1809_v5  ;;  %v1827_v9 = vld [vmem:[%s3387_s1 + $0x1a8] sm:$0xff]  ;;  %v1936_v33 = vld [vmem:[%s3387_s1 + $0x1f0] sm:$0xff] }
   0x4   :  { %110 = vmatpush.msra.mxu0 %v101_v1  ;;  %1654 = vmatpush.msra.mxu3 %v101_v1  ;;  %v93_v3 = vld [vmem:[%s3387_s1 + $0x180] sm:$0xff]  ;;  %v1836_v11 = vld [vmem:[%s3387_s1 + $0x188] sm:$0xff]  ;;  %v100_v34 = vld [vmem:[%s3387_s1 + $0x1b8] sm:$0xff] }
   0x5   :  { %v89_v4 = vld [vmem:[%s3387_s1 + $0x160] sm:$0xff]  ;;  %1670 = vmatpush.msra.mxu1 %v1818_v7  ;;  %v1845_v13 = vld [vmem:[%s3387_s1 + $0x168] sm:$0xff]  ;;  %1685 = vmatpush.msra.mxu2 %v1936_v33  ;;  %v1949_v36 = vld [vmem:[%s3387_s1 + $0x1d0] sm:$0xff] }
   0x6   :  { %111 = vmatpush.msra.mxu0 %v97_v2  ;;  %1655 = vmatpush.msra.mxu3 %v97_v2  ;;  %v85_v6 = vld [vmem:[%s3387_s1 + $0x140] sm:$0xff]  ;;  %v1854_v15 = vld [vmem:[%s3387_s1 + $0x148] sm:$0xff]  ;;  %v96_v38 = vld [vmem:[%s3387_s1 + $0x198] sm:$0xff] }
   0x7   :  { %v81_v8 = vld [vmem:[%s3387_s1 + $0x120] sm:$0xff]  ;;  %1671 = vmatpush.msra.mxu1 %v1827_v9  ;;  %v1863_v17 = vld [vmem:[%s3387_s1 + $0x128] sm:$0xff]  ;;  %1686 = vmatpush.msra.mxu2 %v1949_v36  ;;  %v1972_v41 = vld [vmem:[%s3387_s1 + $0x1b0] sm:$0xff] }
   0x8   :  { %112 = vmatpush.msra.mxu0 %v93_v3  ;;  %1656 = vmatpush.msra.mxu3 %v93_v3  ;;  %v77_v10 = vld [vmem:[%s3387_s1 + $0x100] sm:$0xff]  ;;  %v1872_v19 = vld [vmem:[%s3387_s1 + $0x108] sm:$0xff]  ;;  %v92_v43 = vld [vmem:[%s3387_s1 + $0x178] sm:$0xff] }
   0x9   :  { %v73_v12 = vld [vmem:[%s3387_s1 + $0xe0] sm:$0xff]  ;;  %1672 = vmatpush.msra.mxu1 %v1836_v11  ;;  %v1881_v21 = vld [vmem:[%s3387_s1 + $0xe8] sm:$0xff]  ;;  %1687 = vmatpush.msra.mxu2 %v1972_v41  ;;  %v1988_v44 = vld [vmem:[%s3387_s1 + $0x190] sm:$0xff] }
   0xa   :  { %113 = vmatpush.msra.mxu0 %v89_v4  ;;  %1657 = vmatpush.msra.mxu3 %v89_v4  ;;  %v69_v14 = vld [vmem:[%s3387_s1 + $0xc0] sm:$0xff]  ;;  %v1890_v23 = vld [vmem:[%s3387_s1 + $0xc8] sm:$0xff]  ;;  %v1996_v45 = vld [vmem:[%s3387_s1 + $0x170] sm:$0xff] }
   0xb   :  { %1673 = vmatpush.msra.mxu1 %v1845_v13  ;;  %v65_v16 = vld [vmem:[%s3387_s1 + $0xa0] sm:$0xff]  ;;  %v1899_v25 = vld [vmem:[%s3387_s1 + $0xa8] sm:$0xff]  ;;  %1688 = vmatpush.msra.mxu2 %v1988_v44  ;;  %v2002_v46 = vld [vmem:[%s3388_s0 + $0x10] sm:$0xff] }
   0xc   :  { %114 = vmatpush.msra.mxu0 %v85_v6  ;;  %1658 = vmatpush.msra.mxu3 %v85_v6  ;;  %v61_v18 = vld [vmem:[%s3387_s1 + $0x80] sm:$0xff]  ;;  %v1918_v29 = vld [vmem:[%s3387_s1 + $0x88] sm:$0xff]  ;;  %v2007_v47 = vld [vmem:[%s3388_s0 + $0x30] sm:$0xff] }
   0xd   :  { %1674 = vmatpush.msra.mxu1 %v1854_v15  ;;  %v57_v20 = vld [vmem:[%s3387_s1 + $0x60] sm:$0xff]  ;;  %v58_v32 = vld [vmem:[%s3387_s1 + $0x68] sm:$0xff]  ;;  %1689 = vmatpush.msra.mxu2 %v1996_v45  ;;  %v2013_v48 = vld [vmem:[%s3387_s1 + $0x150] sm:$0xff] }
   0xe   :  { %115 = vmatpush.msra.mxu0 %v81_v8  ;;  %1659 = vmatpush.msra.mxu3 %v81_v8  ;;  %v53_v22 = vld [vmem:[%s3387_s1 + $0x40] sm:$0xff]  ;;  %v54_v35 = vld [vmem:[%s3387_s1 + $0x48] sm:$0xff]  ;;  %v88_v49 = vld [vmem:[%s3387_s1 + $0x158] sm:$0xff] }
   0xf   :  { %1675 = vmatpush.msra.mxu1 %v1863_v17  ;;  %v49_v24 = vld [vmem:[%s3387_s1 + $0x20] sm:$0xff]  ;;  %v1954_v37 = vld [vmem:[%s3388_s0 + $0x8] sm:$0xff]  ;;  %1690 = vmatpush.msra.mxu2 %v2013_v48  ;;  %v83_v50 = vld [vmem:[%s3387_s1 + $0x130] sm:$0xff] }
  0x10   :  { %116 = vmatpush.msra.mxu0 %v77_v10  ;;  %1660 = vmatpush.msra.mxu3 %v77_v10  ;;  %v45_v26 = vld [vmem:[%s3387_s1] sm:$0xff]  ;;  %v1964_v39 = vld [vmem:[%s3388_s0 + $0x28] sm:$0xff]  ;;  %v79_v51 = vld [vmem:[%s3387_s1 + $0x110] sm:$0xff] }
  0x11   :  { %1676 = vmatpush.msra.mxu1 %v1872_v19  ;;  %v1908_v27 = vld [vmem:[%s3388_s0] sm:$0xff]  ;;  %v50_v40 = vld [vmem:[%s3387_s1 + $0x28] sm:$0xff]  ;;  %1691 = vmatpush.msra.mxu2 %v83_v50  ;;  %v2034_v52 = vld [vmem:[%s3388_s0 + $0x18] sm:$0xff] }
  0x12   :  { %117 = vmatpush.msra.mxu0 %v73_v12  ;;  %1661 = vmatpush.msra.mxu3 %v73_v12  ;;  %v1913_v28 = vld [vmem:[%s3388_s0 + $0x20] sm:$0xff]  ;;  %v46_v42 = vld [vmem:[%s3387_s1 + $0x8] sm:$0xff]  ;;  %v2040_v53 = vld [vmem:[%s3388_s0 + $0x38] sm:$0xff] }
  0x13   :  { %1677 = vmatpush.msra.mxu1 %v1881_v21  ;;  %1692 = vmatpush.msra.mxu2 %v79_v51  ;;  %v75_v54 = vld [vmem:[%s3387_s1 + $0xf0] sm:$0xff]  ;;  %v84_v55 = vld [vmem:[%s3387_s1 + $0x138] sm:$0xff]  ;;  %v2067_v60 = vld [vmem:[%s3388_s0 + $0x40] sm:$0xff] }
  0x14   :  { %118 = vmatpush.msra.mxu0 %v69_v14  ;;  %1662 = vmatpush.msra.mxu3 %v69_v14  ;;  %v71_v56 = vld [vmem:[%s3387_s1 + $0xd0] sm:$0xff]  ;;  %v80_v58 = vld [vmem:[%s3387_s1 + $0x118] sm:$0xff]  ;;  %v2090_v1 = vld [vmem:[%s3388_s0 + $0x48] sm:$0xff] }
  0x15   :  { %1678 = vmatpush.msra.mxu1 %v1890_v23  ;;  %1693 = vmatpush.msra.mxu2 %v75_v54  ;;  %v67_v57 = vld [vmem:[%s3387_s1 + $0xb0] sm:$0xff]  ;;  %v76_v62 = vld [vmem:[%s3387_s1 + $0xf8] sm:$0xff]  ;;  %v2144_v12 = vld [vmem:[%s3388_s0 + $0x60] sm:$0xff] }
  0x16   :  { %119 = vmatpush.msra.mxu0 %v65_v16  ;;  %1663 = vmatpush.msra.mxu3 %v65_v16  ;;  %v63_v59 = vld [vmem:[%s3387_s1 + $0x90] sm:$0xff]  ;;  %v72_v3 = vld [vmem:[%s3387_s1 + $0xd8] sm:$0xff]  ;;  %v381_v16 = vld [vmem:[%s3389_s2 + $0x60] sm:$0xff] }
  0x17   :  { %1679 = vmatpush.msra.mxu1 %v1899_v25  ;;  %1694 = vmatpush.msra.mxu2 %v71_v56  ;;  %v59_v61 = vld [vmem:[%s3387_s1 + $0x70] sm:$0xff]  ;;  %v68_v4 = vld [vmem:[%s3387_s1 + $0xb8] sm:$0xff] }
  0x18   :  { %120 = vmatpush.msra.mxu0 %v61_v18  ;;  %1664 = vmatpush.msra.mxu3 %v61_v18  ;;  %v55_v63 = vld [vmem:[%s3387_s1 + $0x50] sm:$0xff]  ;;  %v64_v6 = vld [vmem:[%s3387_s1 + $0x98] sm:$0xff] }
  0x19   :  { %1680 = vmatpush.msra.mxu1 %v1918_v29  ;;  %1695 = vmatpush.msra.mxu2 %v67_v57  ;;  %v51_v0 = vld [vmem:[%s3387_s1 + $0x30] sm:$0xff]  ;;  %v60_v8 = vld [vmem:[%s3387_s1 + $0x78] sm:$0xff] }
  0x1a   :  { %121 = vmatpush.msra.mxu0 %v57_v20  ;;  %1665 = vmatpush.msra.mxu3 %v57_v20  ;;  %v47_v2 = vld [vmem:[%s3387_s1 + $0x10] sm:$0xff]  ;;  %v52_v10 = vld [vmem:[%s3387_s1 + $0x38] sm:$0xff]  ;;  %v378_v20 = vld [vmem:[%s3389_s2 + $0x48] sm:$0xff] }
  0x1b   :  { %1681 = vmatpush.msra.mxu1 %v58_v32  ;;  %1696 = vmatpush.msra.mxu2 %v63_v59  ;;  %v383_v14 = vld [vmem:[%s3389_s2 + $0x70] sm:$0xff]  ;;  %v380_v18 = vld [vmem:[%s3389_s2 + $0x58] sm:$0xff] }
  0x1c   :  { %122 = vmatpush.msra.mxu0 %v53_v22  ;;  %1666 = vmatpush.msra.mxu3 %v53_v22  ;;  %v2186_v22 = vld [vmem:[%s3388_s0 + $0x70] sm:$0xff] }
  0x1d   :  { %1682 = vmatpush.msra.mxu1 %v54_v35  ;;  %1697 = vmatpush.msra.mxu2 %v59_v61 }
  0x1e   :  { %123 = vmatpush.msra.mxu0 %v49_v24  ;;  %1667 = vmatpush.msra.mxu3 %v49_v24  ;;  %v375_v24 = vld [vmem:[%s3389_s2 + $0x30] sm:$0xff] }
  0x1f   :  { %1683 = vmatpush.msra.mxu1 %v50_v40  ;;  %1698 = vmatpush.msra.mxu2 %v55_v63 }
  0x20   :  { %124 = vmatpush.msra.mxu0 %v45_v26  ;;  %1668 = vmatpush.msra.mxu3 %v45_v26  ;;  %v374_v26 = vld [vmem:[%s3389_s2 + $0x28] sm:$0xff] }
  0x21   :  { %125 = vmatmul.f32.vlgmr.msra.gmra.mxu0 %v1908_v27  ;;  %137 = vmatmul.f32.vlgmr.msra.gmra.mxu3 %v1913_v28 }
  0x22   :  { %174 = vmatpush.msrb.mxu0 %v1809_v5  ;;  %304 = vmatpush.msrb.mxu3 %v108_v30  ;;  %v2111_v5 = vld [vmem:[%s3388_s0 + $0x50] sm:$0xff]  ;;  %v2210_v30 = vld [vmem:[%s3388_s0 + $0x78] sm:$0xff] }
  0x23   :  { %1684 = vmatpush.msra.mxu1 %v46_v42  ;;  %1699 = vmatpush.msra.mxu2 %v51_v0 }
  0x24   :  { %175 = vmatpush.msrb.mxu0 %v1818_v7  ;;  %305 = vmatpush.msrb.mxu3 %v104_v31  ;;  %v2123_v7 = vld [vmem:[%s3388_s0 + $0x58] sm:$0xff] }
  0x25   :  { %202 = vmatmul.f32.vlgmr.msra.gmra.mxu1 %v1913_v28  ;;  %1700 = vmatpush.msra.mxu2 %v47_v2  ;;  %v372_v31 = vld [vmem:[%s3389_s2 + $0x18] sm:$0xff] }
  0x26   :  { %176 = vmatpush.msrb.mxu0 %v1827_v9  ;;  %306 = vmatpush.msrb.mxu3 %v100_v34  ;;  %v56_v9 = vld [vmem:[%s3387_s1 + $0x58] sm:$0xff]  ;;  %v369_v34 = vld [vmem:[%s3389_s2] sm:$0xff] }
  0x27   :  { %267 = vmatmul.f32.vlgmr.msra.gmra.mxu2 %v1913_v28 }
  0x28   :  { %177 = vmatpush.msrb.mxu0 %v1836_v11  ;;  %307 = vmatpush.msrb.mxu3 %v96_v38  ;;  %v48_v11 = vld [vmem:[%s3387_s1 + $0x18] sm:$0xff] }
  0x29   :  { %128 = vmatmul.f32.gmra.mxu0 %v1954_v37  ;;  %140 = vmatmul.f32.gmra.mxu3 %v1964_v39  ;;  %v400_v38 = vld [vmem:[%s3389_s2 + $0xf8] sm:$0xff] }
  0x2a   :  { %178 = vmatpush.msrb.mxu0 %v1845_v13  ;;  %308 = vmatpush.msrb.mxu3 %v92_v43  ;;  %v384_v13 = vld [vmem:[%s3389_s2 + $0x78] sm:$0xff]  ;;  %v430_v43 = vld [vmem:[%s3389_s2 + $0x1e8] sm:$0xff] }
  0x2b   :  { %498 = vmatpush.msrb.mxu1 %v400_v38  ;;  %v402_v38 = vld [vmem:[%s3389_s2 + $0x108] sm:$0xff] }
  0x2c   :  { %179 = vmatpush.msrb.mxu0 %v1854_v15  ;;  %309 = vmatpush.msrb.mxu3 %v88_v49  ;;  %v382_v15 = vld [vmem:[%s3389_s2 + $0x68] sm:$0xff] }
  0x2d   :  { %205 = vmatmul.f32.gmra.mxu1 %v1964_v39  ;;  %v394_v49 = vld [vmem:[%s3389_s2 + $0xc8] sm:$0xff] }
  0x2e   :  { %180 = vmatpush.msrb.mxu0 %v1863_v17  ;;  %310 = vmatpush.msrb.mxu3 %v84_v55  ;;  %v2165_v17 = vld [vmem:[%s3388_s0 + $0x68] sm:$0xff]  ;;  %v392_v55 = vld [vmem:[%s3389_s2 + $0xb8] sm:$0xff] }
  0x2f   :  { %270 = vmatmul.f32.gmra.mxu2 %v1964_v39 }
  0x30   :  { %181 = vmatpush.msrb.mxu0 %v1872_v19  ;;  %311 = vmatpush.msrb.mxu3 %v80_v58  ;;  %v379_v19 = vld [vmem:[%s3389_s2 + $0x50] sm:$0xff]  ;;  %v416_v58 = vld [vmem:[%s3389_s2 + $0x178] sm:$0xff] }
  0x31   :  { %131 = vmatmul.f32.gmra.mxu0 %v2002_v46  ;;  %143 = vmatmul.f32.gmra.mxu3 %v2007_v47 }
  0x32   :  { %182 = vmatpush.msrb.mxu0 %v1881_v21  ;;  %312 = vmatpush.msrb.mxu3 %v76_v62  ;;  %v377_v21 = vld [vmem:[%s3389_s2 + $0x40] sm:$0xff] }
  0x33   :  { %563 = vmatpush.msrb.mxu2 %v416_v58  ;;  %v705_v62 = vld [vmem:[%s3390_s3 + $0x60] sm:$0xff]  ;;  %v420_v58 = vld [vmem:[%s3389_s2 + $0x198] sm:$0xff] }
  0x34   :  { %183 = vmatpush.msrb.mxu0 %v1890_v23  ;;  %313 = vmatpush.msrb.mxu3 %v72_v3  ;;  %v376_v23 = vld [vmem:[%s3389_s2 + $0x38] sm:$0xff]  ;;  %v386_v3 = vld [vmem:[%s3389_s2 + $0x88] sm:$0xff] }
  0x35   :  { %208 = vmatmul.f32.gmra.mxu1 %v2007_v47 }
  0x36   :  { %184 = vmatpush.msrb.mxu0 %v1899_v25  ;;  %314 = vmatpush.msrb.mxu3 %v68_v4  ;;  %v432_v25 = vld [vmem:[%s3389_s2 + $0x1f8] sm:$0xff]  ;;  %v385_v4 = vld [vmem:[%s3389_s2 + $0x80] sm:$0xff] }
  0x37   :  { %273 = vmatmul.f32.gmra.mxu2 %v2007_v47 }
  0x38   :  { %185 = vmatpush.msrb.mxu0 %v1918_v29  ;;  %315 = vmatpush.msrb.mxu3 %v64_v6  ;;  %v373_v29 = vld [vmem:[%s3389_s2 + $0x20] sm:$0xff] }
  0x39   :  { %134 = vmatmul.f32.gmra.mxu0 %v2034_v52  ;;  %146 = vmatmul.f32.gmra.mxu3 %v2040_v53 }
  0x3a   :  { %186 = vmatpush.msrb.mxu0 %v58_v32  ;;  %316 = vmatpush.msrb.mxu3 %v60_v8  ;;  %v371_v32 = vld [vmem:[%s3389_s2 + $0x10] sm:$0xff] }
  0x3b   :  { %v427_v8 = vld [vmem:[%s3389_s2 + $0x1d0] sm:$0xff] }
  0x3c   :  { %187 = vmatpush.msrb.mxu0 %v54_v35  ;;  %317 = vmatpush.msrb.mxu3 %v56_v9  ;;  %v431_v35 = vld [vmem:[%s3389_s2 + $0x1f0] sm:$0xff]  ;;  %v704_v9 = vld [vmem:[%s3390_s3 + $0x58] sm:$0xff] }
  0x3d   :  { %211 = vmatmul.f32.gmra.mxu1 %v2040_v53 }
  0x3e   :  { %188 = vmatpush.msrb.mxu0 %v50_v40  ;;  %318 = vmatpush.msrb.mxu3 %v52_v10  ;;  %v399_v40 = vld [vmem:[%s3389_s2 + $0xf0] sm:$0xff]  ;;  %v414_v10 = vld [vmem:[%s3389_s2 + $0x168] sm:$0xff] }
  0x3f   :  { %276 = vmatmul.f32.gmra.mxu2 %v2040_v53  ;;  %499 = vmatpush.msrb.mxu1 %v399_v40 }
  0x40   :  { %189 = vmatpush.msrb.mxu0 %v46_v42  ;;  %319 = vmatpush.msrb.mxu3 %v48_v11  ;;  %v397_v42 = vld [vmem:[%s3389_s2 + $0xe0] sm:$0xff] }
  0x41   :  { %149 = vmatmul.f32.gmra.mxu3 %v2067_v60  ;;  %190 = vmatmul.f32.vlgmr.msrb.gmra.mxu0 %v1908_v27 }
  0x42   :  { %239 = vmatpush.msra.mxu0 %v1936_v33  ;;  %628 = vmatpush.msra.mxu3 %v432_v25  ;;  %v370_v33 = vld [vmem:[%s3389_s2 + $0x8] sm:$0xff]  ;;  %v408_v25 = vld [vmem:[%s3389_s2 + $0x138] sm:$0xff] }
  0x44   :  { %240 = vmatpush.msra.mxu0 %v1949_v36  ;;  %v708_v36 = vld [vmem:[%s3390_s3 + $0x78] sm:$0xff]  ;;  %629 = vmatpush.msra.mxu3 %v431_v35 }
  0x45   :  { %214 = vmatmul.f32.gmra.mxu1 %v2067_v60  ;;  %v404_v35 = vld [vmem:[%s3389_s2 + $0x118] sm:$0xff] }
  0x46   :  { %241 = vmatpush.msra.mxu0 %v1972_v41  ;;  %v398_v41 = vld [vmem:[%s3389_s2 + $0xe8] sm:$0xff]  ;;  %630 = vmatpush.msra.mxu3 %v430_v43  ;;  %v700_v43 = vld [vmem:[%s3390_s3 + $0x38] sm:$0xff] }
  0x47   :  { %279 = vmatmul.f32.gmra.mxu2 %v2067_v60  ;;  %500 = vmatpush.msrb.mxu1 %v398_v41  ;;  %v401_v41 = vld [vmem:[%s3389_s2 + $0x100] sm:$0xff] }
  0x48   :  { %242 = vmatpush.msra.mxu0 %v1988_v44  ;;  %v707_v44 = vld [vmem:[%s3390_s3 + $0x70] sm:$0xff] }
  0x49   :  { %152 = vmatmul.f32.gmra.mxu3 %v2090_v1  ;;  %193 = vmatmul.f32.gmra.mxu0 %v1954_v37 }
  0x4a   :  { %243 = vmatpush.msra.mxu0 %v1996_v45  ;;  %v396_v45 = vld [vmem:[%s3389_s2 + $0xd8] sm:$0xff]  ;;  %501 = vmatpush.msrb.mxu1 %v397_v42 }
  0x4c   :  { %244 = vmatpush.msra.mxu0 %v2013_v48  ;;  %v395_v48 = vld [vmem:[%s3389_s2 + $0xd0] sm:$0xff]  ;;  %502 = vmatpush.msrb.mxu1 %v396_v45 }
  0x4d   :  { %217 = vmatmul.f32.gmra.mxu1 %v2090_v1 }
  0x4e   :  { %245 = vmatpush.msra.mxu0 %v83_v50  ;;  %503 = vmatpush.msrb.mxu1 %v395_v48  ;;  %v393_v50 = vld [vmem:[%s3389_s2 + $0xc0] sm:$0xff] }
  0x4f   :  { %282 = vmatmul.f32.gmra.mxu2 %v2090_v1 }
  0x50   :  { %246 = vmatpush.msra.mxu0 %v79_v51  ;;  %504 = vmatpush.msrb.mxu1 %v394_v49  ;;  %v429_v51 = vld [vmem:[%s3389_s2 + $0x1e0] sm:$0xff]  ;;  %v422_v49 = vld [vmem:[%s3389_s2 + $0x1a8] sm:$0xff] }
  0x51   :  { %155 = vmatmul.f32.gmra.mxu3 %v2111_v5  ;;  %196 = vmatmul.f32.gmra.mxu0 %v2002_v46 }
  0x52   :  { %247 = vmatpush.msra.mxu0 %v75_v54  ;;  %v706_v54 = vld [vmem:[%s3390_s3 + $0x68] sm:$0xff]  ;;  %505 = vmatpush.msrb.mxu1 %v393_v50 }
  0x53   :  { %631 = vmatpush.msra.mxu3 %v429_v51 }
  0x54   :  { %248 = vmatpush.msra.mxu0 %v71_v56  ;;  %v391_v56 = vld [vmem:[%s3389_s2 + $0xb0] sm:$0xff]  ;;  %506 = vmatpush.msrb.mxu1 %v392_v55  ;;  %v698_v55 = vld [vmem:[%s3390_s3 + $0x28] sm:$0xff] }
  0x55   :  { %220 = vmatmul.f32.gmra.mxu1 %v2111_v5 }
  0x56   :  { %249 = vmatpush.msra.mxu0 %v67_v57  ;;  %v390_v57 = vld [vmem:[%s3389_s2 + $0xa8] sm:$0xff]  ;;  %507 = vmatpush.msrb.mxu1 %v391_v56 }
  0x57   :  { %285 = vmatmul.f32.gmra.mxu2 %v2111_v5 }
  0x58   :  { %250 = vmatpush.msra.mxu0 %v63_v59  ;;  %v389_v59 = vld [vmem:[%s3389_s2 + $0xa0] sm:$0xff]  ;;  %508 = vmatpush.msrb.mxu1 %v390_v57 }
  0x59   :  { %158 = vmatmul.f32.gmra.mxu3 %v2123_v7  ;;  %199 = vmatmul.f32.gmra.mxu0 %v2034_v52 }
  0x5a   :  { %251 = vmatpush.msra.mxu0 %v59_v61  ;;  %v428_v61 = vld [vmem:[%s3389_s2 + $0x1d8] sm:$0xff]  ;;  %509 = vmatpush.msrb.mxu1 %v389_v59 }
  0x5b   :  { %632 = vmatpush.msra.mxu3 %v428_v61 }
  0x5c   :  { %252 = vmatpush.msra.mxu0 %v55_v63  ;;  %v388_v63 = vld [vmem:[%s3389_s2 + $0x98] sm:$0xff] }
  0x5d   :  { %223 = vmatmul.f32.gmra.mxu1 %v2123_v7  ;;  %633 = vmatpush.msra.mxu3 %v427_v8 }
  0x5e   :  { %253 = vmatpush.msra.mxu0 %v51_v0  ;;  %v387_v0 = vld [vmem:[%s3389_s2 + $0x90] sm:$0xff]  ;;  %510 = vmatpush.msrb.mxu1 %v388_v63 }
  0x5f   :  { %288 = vmatmul.f32.gmra.mxu2 %v2123_v7  ;;  %v419_v63 = vld [vmem:[%s3389_s2 + $0x190] sm:$0xff] }
  0x60   :  { %254 = vmatpush.msra.mxu0 %v47_v2  ;;  %v415_v2 = vld [vmem:[%s3389_s2 + $0x170] sm:$0xff]  ;;  %511 = vmatpush.msrb.mxu1 %v387_v0  ;;  %v418_v0 = vld [vmem:[%s3389_s2 + $0x188] sm:$0xff] }
  0x61   :  { %161 = vmatmul.f32.gmra.mxu3 %v2144_v12  ;;  %255 = vmatmul.f32.vlgmr.msra.gmra.mxu0 %v1908_v27 }
  0x62   :  { %433 = vmatpush.msrb.mxu0 %v384_v13  ;;  %564 = vmatpush.msrb.mxu2 %v415_v2  ;;  %v413_v13 = vld [vmem:[%s3389_s2 + $0x160] sm:$0xff] }
  0x63   :  { %512 = vmatpush.msrb.mxu1 %v386_v3  ;;  %v417_v3 = vld [vmem:[%s3389_s2 + $0x180] sm:$0xff] }
  0x64   :  { %434 = vmatpush.msrb.mxu0 %v383_v14  ;;  %565 = vmatpush.msrb.mxu2 %v414_v10 }
  0x65   :  { %226 = vmatmul.f32.gmra.mxu1 %v2144_v12 }
  0x66   :  { %435 = vmatpush.msrb.mxu0 %v382_v15  ;;  %513 = vmatpush.msrb.mxu1 %v385_v4  ;;  %v703_v15 = vld [vmem:[%s3390_s3 + $0x50] sm:$0xff] }
  0x67   :  { %291 = vmatmul.f32.gmra.mxu2 %v2144_v12 }
  0x68   :  { %436 = vmatpush.msrb.mxu0 %v381_v16  ;;  %566 = vmatpush.msrb.mxu2 %v413_v13  ;;  %v412_v16 = vld [vmem:[%s3389_s2 + $0x158] sm:$0xff] }
  0x69   :  { %164 = vmatmul.f32.gmra.mxu3 %v2165_v17  ;;  %258 = vmatmul.f32.gmra.mxu0 %v1954_v37 }
  0x6a   :  { %437 = vmatpush.msrb.mxu0 %v380_v18  ;;  %567 = vmatpush.msrb.mxu2 %v412_v16  ;;  %v411_v18 = vld [vmem:[%s3389_s2 + $0x150] sm:$0xff] }
  0x6c   :  { %438 = vmatpush.msrb.mxu0 %v379_v19  ;;  %568 = vmatpush.msrb.mxu2 %v411_v18  ;;  %v410_v19 = vld [vmem:[%s3389_s2 + $0x148] sm:$0xff]  ;;  %v869_v18 = vld [vmem:[%s3391_s4 + $0xf8] sm:$0xff] }
  0x6d   :  { %229 = vmatmul.f32.gmra.mxu1 %v2165_v17 }
  0x6e   :  { %439 = vmatpush.msrb.mxu0 %v378_v20  ;;  %569 = vmatpush.msrb.mxu2 %v410_v19 }
  0x6f   :  { %294 = vmatmul.f32.gmra.mxu2 %v2165_v17 }
  0x70   :  { %440 = vmatpush.msrb.mxu0 %v377_v21  ;;  %v409_v21 = vld [vmem:[%s3389_s2 + $0x140] sm:$0xff] }
  0x71   :  { %167 = vmatmul.f32.gmra.mxu3 %v2186_v22  ;;  %261 = vmatmul.f32.gmra.mxu0 %v2002_v46 }
  0x72   :  { %441 = vmatpush.msrb.mxu0 %v376_v23  ;;  %570 = vmatpush.msrb.mxu2 %v409_v21  ;;  %v885_v21 = vld [vmem:[%s3391_s4 + $0x178] sm:$0xff] }
  0x74   :  { %442 = vmatpush.msrb.mxu0 %v375_v24  ;;  %v702_v24 = vld [vmem:[%s3390_s3 + $0x48] sm:$0xff]  ;;  %571 = vmatpush.msrb.mxu2 %v408_v25 }
  0x75   :  { %232 = vmatmul.f32.gmra.mxu1 %v2186_v22 }
  0x76   :  { %443 = vmatpush.msrb.mxu0 %v374_v26  ;;  %v407_v26 = vld [vmem:[%s3389_s2 + $0x130] sm:$0xff] }
  0x77   :  { %297 = vmatmul.f32.gmra.mxu2 %v2186_v22 }
  0x78   :  { %444 = vmatpush.msrb.mxu0 %v373_v29  ;;  %572 = vmatpush.msrb.mxu2 %v407_v26  ;;  %v406_v29 = vld [vmem:[%s3389_s2 + $0x128] sm:$0xff] }
  0x79   :  { %170 = vmatmul.f32.gmra.mxu3 %v2210_v30  ;;  %264 = vmatmul.f32.gmra.mxu0 %v2034_v52 }
  0x7a   :  { %445 = vmatpush.msrb.mxu0 %v372_v31  ;;  %573 = vmatpush.msrb.mxu2 %v406_v29  ;;  %v868_v29 = vld [vmem:[%s3391_s4 + $0xf0] sm:$0xff] }
  0x7c   :  { %446 = vmatpush.msrb.mxu0 %v371_v32  ;;  %v405_v32 = vld [vmem:[%s3389_s2 + $0x120] sm:$0xff] }
  0x7d   :  { %235 = vmatmul.f32.gmra.mxu1 %v2210_v30  ;;  %574 = vmatpush.msrb.mxu2 %v405_v32  ;;  %v901_v32 = vld [vmem:[%s3391_s4 + $0x1f8] sm:$0xff] }
  0x7e   :  { %447 = vmatpush.msrb.mxu0 %v370_v33 }
  0x7f   :  { %300 = vmatmul.f32.gmra.mxu2 %v2210_v30 }
  0x80   :  { %448 = vmatpush.msrb.mxu0 %v369_v34  ;;  %v701_v34 = vld [vmem:[%s3390_s3 + $0x40] sm:$0xff]  ;;  %575 = vmatpush.msrb.mxu2 %v404_v35 }
  0x81   :  { %320 = vmatmul.f32.vlgmr.msrb.gmra.mxu3 %v1908_v27 }
  0x82   :  { %709 = vmatpush.msra.mxu0 %v708_v36  ;;  %v403_v36 = vld [vmem:[%s3389_s2 + $0x110] sm:$0xff] }
  0x83   :  { %576 = vmatpush.msrb.mxu2 %v403_v36  ;;  %v851_v36 = vld [vmem:[%s3391_s4 + $0x68] sm:$0xff] }
  0x84   :  { %710 = vmatpush.msra.mxu0 %v707_v44 }
  0x85   :  { %577 = vmatpush.msrb.mxu2 %v402_v38 }
  0x86   :  { %711 = vmatpush.msra.mxu0 %v706_v54  ;;  %v421_v54 = vld [vmem:[%s3389_s2 + $0x1a0] sm:$0xff] }
  0x87   :  { %578 = vmatpush.msrb.mxu2 %v401_v41  ;;  %v867_v41 = vld [vmem:[%s3391_s4 + $0xe8] sm:$0xff] }
  0x88   :  { %712 = vmatpush.msra.mxu0 %v705_v62 }
  0x89   :  { %323 = vmatmul.f32.gmra.mxu3 %v1954_v37  ;;  %967 = vmatpush.msra.mxu2 %v869_v18  ;;  %v844_v18 = vld [vmem:[%s3391_s4 + $0x30] sm:$0xff] }
  0x8a   :  { %713 = vmatpush.msra.mxu0 %v704_v9  ;;  %v695_v9 = vld [vmem:[%s3390_s3 + $0x10] sm:$0xff] }
  0x8b   :  { %968 = vmatpush.msra.mxu2 %v868_v29  ;;  %v842_v29 = vld [vmem:[%s3391_s4 + $0x20] sm:$0xff] }
  0x8c   :  { %714 = vmatpush.msra.mxu0 %v703_v15  ;;  %v694_v15 = vld [vmem:[%s3390_s3 + $0x8] sm:$0xff] }
  0x8d   :  { %969 = vmatpush.msra.mxu2 %v867_v41 }
  0x8e   :  { %715 = vmatpush.msra.mxu0 %v702_v24 }
  0x90   :  { %716 = vmatpush.msra.mxu0 %v701_v34 }
  0x91   :  { %326 = vmatmul.f32.gmra.mxu3 %v2002_v46 }
  0x92   :  { %717 = vmatpush.msra.mxu0 %v700_v43  ;;  %v883_v43 = vld [vmem:[%s3391_s4 + $0x168] sm:$0xff] }
  0x99   :  { %329 = vmatmul.f32.gmra.mxu3 %v2034_v52 }
  0x9e   :  { %v2315_v6 = vpop.f32.mrf.mxu0 }
  0x9f   :  { %449 = vmatmul.f32.vlgmr.msrb.gmra.mxu0 %v2315_v6 }
  0xa1   :  { %332 = vmatmul.f32.gmra.mxu3 %v1913_v28  ;;  %v426_v28 = vld [vmem:[%s3389_s2 + $0x1c8] sm:$0xff] }
  0xa2   :  { %634 = vmatpush.msra.mxu3 %v426_v28  ;;  %v2423_v48 = vpop.f32.mrf.mxu1 }
  0xa4   :  { %v2329_v11 = vpop.f32.mrf.mxu3 }
  0xa6   :  { %v2334_v14 = vpop.f32.mrf.mxu0 }
  0xa7   :  { %452 = vmatmul.f32.gmra.mxu0 %v2334_v14 }
  0xa9   :  { %335 = vmatmul.f32.gmra.mxu3 %v1964_v39  ;;  %v425_v39 = vld [vmem:[%s3389_s2 + $0x1c0] sm:$0xff] }
  0xaa   :  { %635 = vmatpush.msra.mxu3 %v425_v39  ;;  %v853_v39 = vld [vmem:[%s3391_s4 + $0x78] sm:$0xff] }
  0xab   :  { %902 = vmatpush.msra.mxu1 %v853_v39  ;;  %v865_v39 = vld [vmem:[%s3391_s4 + $0xd8] sm:$0xff] }
  0xac   :  { %v2353_v20 = vpop.f32.mrf.mxu3 }
  0xae   :  { %v2358_v23 = vpop.f32.mrf.mxu0 }
  0xaf   :  { %455 = vmatmul.f32.gmra.mxu0 %v2358_v23 }
  0xb1   :  { %338 = vmatmul.f32.gmra.mxu3 %v2007_v47  ;;  %v424_v47 = vld [vmem:[%s3389_s2 + $0x1b8] sm:$0xff] }
  0xb2   :  { %636 = vmatpush.msra.mxu3 %v424_v47  ;;  %v852_v47 = vld [vmem:[%s3391_s4 + $0x70] sm:$0xff] }
  0xb3   :  { %903 = vmatpush.msra.mxu1 %v852_v47  ;;  %v898_v47 = vld [vmem:[%s3391_s4 + $0x1e0] sm:$0xff] }
  0xb4   :  { %v2377_v31 = vpop.f32.mrf.mxu3 }
  0xb5   :  { %904 = vmatpush.msra.mxu1 %v851_v36  ;;  %v841_v36 = vld [vmem:[%s3391_s4 + $0x18] sm:$0xff] }
  0xb6   :  { %v2382_v33 = vpop.f32.mrf.mxu0 }
  0xb7   :  { %458 = vmatmul.f32.gmra.mxu0 %v2382_v33 }
  0xb9   :  { %341 = vmatmul.f32.gmra.mxu3 %v2040_v53  ;;  %v423_v53 = vld [vmem:[%s3389_s2 + $0x1b0] sm:$0xff] }
  0xba   :  { %637 = vmatpush.msra.mxu3 %v423_v53  ;;  %v850_v53 = vld [vmem:[%s3391_s4 + $0x60] sm:$0xff] }
  0xbb   :  { %905 = vmatpush.msra.mxu1 %v850_v53  ;;  %v840_v53 = vld [vmem:[%s3391_s4 + $0x10] sm:$0xff] }
  0xbc   :  { %v2401_v40 = vpop.f32.mrf.mxu3  ;;  %638 = vmatpush.msra.mxu3 %v422_v49  ;;  %v900_v49 = vld [vmem:[%s3391_s4 + $0x1f0] sm:$0xff] }
  0xbe   :  { %v2406_v42 = vpop.f32.mrf.mxu0  ;;  %639 = vmatpush.msra.mxu3 %v421_v54  ;;  %v848_v54 = vld [vmem:[%s3391_s4 + $0x50] sm:$0xff] }
  0xbf   :  { %461 = vmatmul.f32.gmra.mxu0 %v2329_v11  ;;  %514 = vmatmul.f32.vlgmr.msrb.gmra.mxu1 %v2406_v42 }
  0xc0   :  { %640 = vmatpush.msra.mxu3 %v420_v58  ;;  %v847_v58 = vld [vmem:[%s3391_s4 + $0x48] sm:$0xff] }
  0xc1   :  { %344 = vmatmul.f32.gmra.mxu3 %v2067_v60  ;;  %v699_v60 = vld [vmem:[%s3390_s3 + $0x30] sm:$0xff] }
  0xc2   :  { %718 = vmatpush.msra.mxu0 %v699_v60  ;;  %641 = vmatpush.msra.mxu3 %v419_v63  ;;  %v849_v60 = vld [vmem:[%s3391_s4 + $0x58] sm:$0xff]  ;;  %v866_v63 = vld [vmem:[%s3391_s4 + $0xe0] sm:$0xff] }
  0xc3   :  { %906 = vmatpush.msra.mxu1 %v849_v60  ;;  %970 = vmatpush.msra.mxu2 %v866_v63  ;;  %v839_v60 = vld [vmem:[%s3391_s4 + $0x8] sm:$0xff]  ;;  %v880_v63 = vld [vmem:[%s3391_s4 + $0x150] sm:$0xff] }
  0xc4   :  { %v2417_v44 = vpop.f32.mrf.mxu3  ;;  %719 = vmatpush.msra.mxu0 %v698_v55  ;;  %642 = vmatpush.msra.mxu3 %v418_v0 }
  0xc5   :  { %907 = vmatpush.msra.mxu1 %v848_v54  ;;  %971 = vmatpush.msra.mxu2 %v865_v39  ;;  %v864_v54 = vld [vmem:[%s3391_s4 + $0xd0] sm:$0xff] }
  0xc6   :  { %v2419_v45 = vpop.f32.mrf.mxu0  ;;  %643 = vmatpush.msra.mxu3 %v417_v3  ;;  %v882_v3 = vld [vmem:[%s3391_s4 + $0x160] sm:$0xff]  ;;  %v896_v39 = vld [vmem:[%s3391_s4 + $0x1d0] sm:$0xff] }
  0xc7   :  { %464 = vmatmul.f32.gmra.mxu0 %v2353_v20  ;;  %517 = vmatmul.f32.gmra.mxu1 %v2419_v45 }
  0xc8   :  { %1032 = vmatpush.msrb.mxu3 %v885_v21  ;;  %908 = vmatpush.msra.mxu1 %v847_v58  ;;  %v843_v21 = vld [vmem:[%s3391_s4 + $0x28] sm:$0xff]  ;;  %v838_v58 = vld [vmem:[%s3391_s4] sm:$0xff] }
  0xc9   :  { %347 = vmatmul.f32.gmra.mxu3 %v2090_v1  ;;  %v2445_v1 = vpop.f32.mrf.mxu1  ;;  %972 = vmatpush.msra.mxu2 %v864_v54  ;;  %v861_v54 = vld [vmem:[%s3391_s4 + $0xb8] sm:$0xff] }
  0xcc   :  { %v2432_v50 = vpop.f32.mrf.mxu3 }
  0xce   :  { %v2434_v51 = vpop.f32.mrf.mxu0 }
  0xcf   :  { %467 = vmatmul.f32.gmra.mxu0 %v2377_v31  ;;  %520 = vmatmul.f32.gmra.mxu1 %v2434_v51 }
  0xd1   :  { %350 = vmatmul.f32.gmra.mxu3 %v2111_v5  ;;  %v697_v5 = vld [vmem:[%s3390_s3 + $0x20] sm:$0xff]  ;;  %v2460_v59 = vpop.f32.mrf.mxu1 }
  0xd2   :  { %720 = vmatpush.msra.mxu0 %v697_v5 }
  0xd4   :  { %v2447_v56 = vpop.f32.mrf.mxu3 }
  0xd6   :  { %v2449_v57 = vpop.f32.mrf.mxu0 }
  0xd7   :  { %470 = vmatmul.f32.gmra.mxu0 %v2401_v40  ;;  %523 = vmatmul.f32.gmra.mxu1 %v2449_v57 }
  0xd9   :  { %353 = vmatmul.f32.gmra.mxu3 %v2123_v7  ;;  %v696_v7 = vld [vmem:[%s3390_s3 + $0x18] sm:$0xff]  ;;  %v2484_v4 = vpop.f32.mrf.mxu1 }
  0xda   :  { %721 = vmatpush.msra.mxu0 %v696_v7  ;;  %v846_v7 = vld [vmem:[%s3391_s4 + $0x40] sm:$0xff] }
  0xdb   :  { %909 = vmatpush.msra.mxu1 %v846_v7  ;;  %v897_v7 = vld [vmem:[%s3391_s4 + $0x1d8] sm:$0xff] }
  0xdc   :  { %v2462_v61 = vpop.f32.mrf.mxu3  ;;  %722 = vmatpush.msra.mxu0 %v695_v9  ;;  %v899_v9 = vld [vmem:[%s3391_s4 + $0x1e8] sm:$0xff] }
  0xde   :  { %v2464_v62 = vpop.f32.mrf.mxu0  ;;  %723 = vmatpush.msra.mxu0 %v694_v15  ;;  %v845_v15 = vld [vmem:[%s3391_s4 + $0x38] sm:$0xff] }
  0xdf   :  { %473 = vmatmul.f32.gmra.mxu0 %v2417_v44  ;;  %526 = vmatmul.f32.gmra.mxu1 %v2423_v48 }
  0xe0   :  { %579 = vmatmul.f32.vlgmr.msrb.gmra.mxu2 %v2464_v62  ;;  %910 = vmatpush.msra.mxu1 %v845_v15 }
  0xe1   :  { %356 = vmatmul.f32.gmra.mxu3 %v2144_v12  ;;  %v2490_v12 = vpop.f32.mrf.mxu2  ;;  %v2503_v28 = vpop.f32.mrf.mxu1 }
  0xe2   :  { %911 = vmatpush.msra.mxu1 %v844_v18  ;;  %v863_v18 = vld [vmem:[%s3391_s4 + $0xc8] sm:$0xff] }
  0xe3   :  { %973 = vmatpush.msra.mxu2 %v863_v18  ;;  %v859_v18 = vld [vmem:[%s3391_s4 + $0xa8] sm:$0xff] }
  0xe4   :  { %v2479_v2 = vpop.f32.mrf.mxu3  ;;  %912 = vmatpush.msra.mxu1 %v843_v21  ;;  %v879_v21 = vld [vmem:[%s3391_s4 + $0x148] sm:$0xff] }
  0xe6   :  { %v2486_v8 = vpop.f32.mrf.mxu0  ;;  %913 = vmatpush.msra.mxu1 %v842_v29 }
  0xe7   :  { %476 = vmatmul.f32.gmra.mxu0 %v2432_v50  ;;  %529 = vmatmul.f32.gmra.mxu1 %v2445_v1 }
  0xe8   :  { %582 = vmatmul.f32.gmra.mxu2 %v2486_v8  ;;  %914 = vmatpush.msra.mxu1 %v841_v36  ;;  %v862_v36 = vld [vmem:[%s3391_s4 + $0xc0] sm:$0xff] }
  0xe9   :  { %359 = vmatmul.f32.gmra.mxu3 %v2165_v17  ;;  %v2510_v17 = vpop.f32.mrf.mxu2  ;;  %v2532_v24 = vpop.f32.mrf.mxu1  ;;  %974 = vmatpush.msra.mxu2 %v862_v36  ;;  %v877_v36 = vld [vmem:[%s3391_s4 + $0x138] sm:$0xff] }
  0xea   :  { %915 = vmatpush.msra.mxu1 %v840_v53  ;;  %v878_v53 = vld [vmem:[%s3391_s4 + $0x140] sm:$0xff] }
  0xeb   :  { %975 = vmatpush.msra.mxu2 %v861_v54 }
  0xec   :  { %v2497_v10 = vpop.f32.mrf.mxu3  ;;  %916 = vmatpush.msra.mxu1 %v839_v60  ;;  %v895_v60 = vld [vmem:[%s3391_s4 + $0x1c8] sm:$0xff] }
  0xee   :  { %v2499_v13 = vpop.f32.mrf.mxu0  ;;  %917 = vmatpush.msra.mxu1 %v838_v58 }
  0xef   :  { %479 = vmatmul.f32.gmra.mxu0 %v2447_v56  ;;  %532 = vmatmul.f32.gmra.mxu1 %v2460_v59 }
  0xf0   :  { %585 = vmatmul.f32.gmra.mxu2 %v2499_v13 }
  0xf1   :  { %362 = vmatmul.f32.gmra.mxu3 %v2186_v22  ;;  %v693_v22 = vld [vmem:[%s3390_s3] sm:$0xff]  ;;  %v2534_v25 = vpop.f32.mrf.mxu2  ;;  %v2553_v34 = vpop.f32.mrf.mxu1 }
  0xf2   :  { %724 = vmatpush.msra.mxu0 %v693_v22 }
  0xf4   :  { %v2512_v16 = vpop.f32.mrf.mxu3  ;;  %1097 = vmatpush.msrb.mxu0 %v901_v32  ;;  %v881_v32 = vld [vmem:[%s3391_s4 + $0x158] sm:$0xff] }
  0xf6   :  { %v2517_v19 = vpop.f32.mrf.mxu0  ;;  %1098 = vmatpush.msrb.mxu0 %v900_v49 }
  0xf7   :  { %482 = vmatmul.f32.gmra.mxu0 %v2462_v61  ;;  %535 = vmatmul.f32.gmra.mxu1 %v2484_v4 }
  0xf8   :  { %588 = vmatmul.f32.gmra.mxu2 %v2517_v19  ;;  %1099 = vmatpush.msrb.mxu0 %v899_v9 }
  0xf9   :  { %365 = vmatmul.f32.gmra.mxu3 %v2210_v30  ;;  %v884_v30 = vld [vmem:[%s3391_s4 + $0x170] sm:$0xff]  ;;  %v2561_v38 = vpop.f32.mrf.mxu2  ;;  %v2590_v5 = vpop.f32.mrf.mxu1 }
  0xfa   :  { %1033 = vmatpush.msrb.mxu3 %v884_v30  ;;  %1100 = vmatpush.msrb.mxu0 %v898_v47 }
  0xfc   :  { %v2536_v26 = vpop.f32.mrf.mxu3  ;;  %1034 = vmatpush.msrb.mxu3 %v883_v43  ;;  %1101 = vmatpush.msrb.mxu0 %v897_v7 }
  0xfe   :  { %1035 = vmatpush.msrb.mxu3 %v882_v3  ;;  %1102 = vmatpush.msrb.mxu0 %v896_v39  ;;  %v858_v39 = vld [vmem:[%s3391_s4 + $0xa0] sm:$0xff] }
  0xff   :  { %485 = vmatmul.f32.gmra.mxu0 %v2479_v2  ;;  %538 = vmatmul.f32.gmra.mxu1 %v2503_v28 }
 0x100   :  { %591 = vmatmul.f32.gmra.mxu2 %v2490_v12  ;;  %1036 = vmatpush.msrb.mxu3 %v881_v32 }
 0x101   :  { %v2600_v0 = vpop.f32.mrf.mxu2  ;;  %v2629_v30 = vpop.f32.mrf.mxu1  ;;  %1103 = vmatpush.msrb.mxu0 %v895_v60 }
 0x102   :  { %1037 = vmatpush.msrb.mxu3 %v880_v63 }
 0x104   :  { %v2555_v35 = vpop.f32.mrf.mxu3  ;;  %1038 = vmatpush.msrb.mxu3 %v879_v21 }
 0x105   :  { %644 = vmatmul.f32.vlgmr.msra.gmra.mxu3 %v2555_v35 }
 0x106   :  { %1039 = vmatpush.msrb.mxu3 %v878_v53  ;;  %v894_v53 = vld [vmem:[%s3391_s4 + $0x1c0] sm:$0xff] }
 0x107   :  { %488 = vmatmul.f32.gmra.mxu0 %v2497_v10  ;;  %541 = vmatmul.f32.gmra.mxu1 %v2532_v24 }
 0x108   :  { %594 = vmatmul.f32.gmra.mxu2 %v2510_v17  ;;  %1040 = vmatpush.msrb.mxu3 %v877_v36  ;;  %v1734_v36 = vld [vmem:[%s3388_s0 + $0x20] sm:$0xff] }
 0x109   :  { %v2641_v41 = vpop.f32.mrf.mxu2  ;;  %v2669_v3 = vpop.f32.mrf.mxu1  ;;  %1104 = vmatpush.msrb.mxu0 %v894_v53  ;;  %v893_v53 = vld [vmem:[%s3391_s4 + $0x1b8] sm:$0xff] }
 0x10b   :  { %1105 = vmatpush.msrb.mxu0 %v893_v53 }
 0x10c   :  { %v2584_v55 = vpop.f32.mrf.mxu3 }
 0x10d   :  { %647 = vmatmul.f32.gmra.mxu3 %v2584_v55 }
 0x10f   :  { %491 = vmatmul.f32.gmra.mxu0 %v2512_v16  ;;  %544 = vmatmul.f32.gmra.mxu1 %v2553_v34 }
 0x110   :  { %597 = vmatmul.f32.gmra.mxu2 %v2534_v25 }
 0x111   :  { %v2671_v9 = vpop.f32.mrf.mxu2  ;;  %v2690_v29 = vpop.f32.mrf.mxu1 }
 0x114   :  { %v2615_v22 = vpop.f32.mrf.mxu3 }
 0x115   :  { %650 = vmatmul.f32.gmra.mxu3 %v2615_v22 }
 0x117   :  { %494 = vmatmul.f32.gmra.mxu0 %v2536_v26  ;;  %547 = vmatmul.f32.gmra.mxu1 %v2590_v5 }
 0x118   :  { %600 = vmatmul.f32.gmra.mxu2 %v2561_v38 }
 0x119   :  { %v2722_v7 = vpop.f32.mrf.mxu1 }
 0x11a   :  { %3408 = vst [vmem:[#allocation3_spill] sm:$0xff] %v2722_v7 }
 0x11c   :  { %v2646_v43 = vpop.f32.mrf.mxu3  ;;  %v2648_v49 = vpop.f32.mrf.mxu0 }
 0x11d   :  { %653 = vmatmul.f32.gmra.mxu3 %v2646_v43 }
 0x11f   :  { %550 = vmatmul.f32.gmra.mxu1 %v2629_v30  ;;  %725 = vmatmul.f32.vlgmr.msra.gmra.mxu0 %v1908_v27 }
 0x120   :  { %603 = vmatmul.f32.gmra.mxu2 %v2600_v0 }
 0x124   :  { %v2673_v15 = vpop.f32.mrf.mxu3  ;;  %v2675_v27 = vpop.f32.mrf.mxu0 }
 0x125   :  { %656 = vmatmul.f32.gmra.mxu3 %v2673_v15 }
 0x127   :  { %553 = vmatmul.f32.gmra.mxu1 %v2669_v3  ;;  %728 = vmatmul.f32.gmra.mxu0 %v1954_v37  ;;  %v2697_v37 = vpop.f32.mrf.mxu2 }
 0x128   :  { %606 = vmatmul.f32.gmra.mxu2 %v2641_v41  ;;  %3407 = vst [vmem:[#allocation2_spill] sm:$0xff] %v2697_v37 }
 0x12c   :  { %v2692_v32 = vpop.f32.mrf.mxu3  ;;  %v2694_v47 = vpop.f32.mrf.mxu0 }
 0x12d   :  { %659 = vmatmul.f32.gmra.mxu3 %v2692_v32 }
 0x12f   :  { %556 = vmatmul.f32.gmra.mxu1 %v2690_v29  ;;  %731 = vmatmul.f32.gmra.mxu0 %v2002_v46  ;;  %v860_v46 = vld [vmem:[%s3391_s4 + $0xb0] sm:$0xff]  ;;  %v2729_v21 = vpop.f32.mrf.mxu2 }
 0x130   :  { %609 = vmatmul.f32.gmra.mxu2 %v2671_v9  ;;  %3409 = vst [vmem:[#allocation4_spill] sm:$0xff] %v2729_v21 }
 0x131   :  { %976 = vmatpush.msra.mxu2 %v860_v46  ;;  %v774_v46 = vmul.f32 %v2315_v6, %v2315_v6  ;;  %v876_v6 = vld [vmem:[%s3391_s4 + $0x130] sm:$0xff] }
 0x132   :  { %1041 = vmatpush.msrb.mxu3 %v876_v6  ;;  %v892_v6 = vld [vmem:[%s3391_s4 + $0x1b0] sm:$0xff] }
 0x133   :  { %977 = vmatpush.msra.mxu2 %v859_v18  ;;  %v856_v18 = vld [vmem:[%s3391_s4 + $0x90] sm:$0xff]  ;;  %1106 = vmatpush.msrb.mxu0 %v892_v6  ;;  %v891_v6 = vld [vmem:[%s3391_s4 + $0x1a8] sm:$0xff] }
 0x134   :  { %v2717_v58 = vpop.f32.mrf.mxu3  ;;  %v2719_v63 = vpop.f32.mrf.mxu0 }
 0x135   :  { %662 = vmatmul.f32.gmra.mxu3 %v2717_v58  ;;  %978 = vmatpush.msra.mxu2 %v858_v39  ;;  %v855_v39 = vld [vmem:[%s3391_s4 + $0x88] sm:$0xff] }
 0x136   :  { %1107 = vmatpush.msrb.mxu0 %v891_v6 }
 0x137   :  { %559 = vmatmul.f32.gmra.mxu1 %v2722_v7  ;;  %734 = vmatmul.f32.gmra.mxu0 %v2034_v52  ;;  %v857_v52 = vld [vmem:[%s3391_s4 + $0x98] sm:$0xff]  ;;  %v870_v7 = vld [vmem:[%s3391_s4 + $0x100] sm:$0xff] }
 0x138   :  { %612 = vmatmul.f32.gmra.mxu2 %v2697_v37  ;;  %v778_v37 = vmul.f32 %v2334_v14, %v2334_v14 }
 0x139   :  { %979 = vmatpush.msra.mxu2 %v857_v52  ;;  %v2767_v52 = vpop.f32.mrf.mxu2 }
 0x13a   :  { %3410 = vst [vmem:[#allocation5_spill] sm:$0xff] %v2767_v52 }
 0x13b   :  { %980 = vmatpush.msra.mxu2 %v856_v18  ;;  %v1735_v18 = vld [vmem:[%s3388_s0 + $0x28] sm:$0xff] }
 0x13c   :  { %v2744_v60 = vpop.f32.mrf.mxu3  ;;  %v2746_v54 = vpop.f32.mrf.mxu0 }
 0x13d   :  { %665 = vmatmul.f32.gmra.mxu3 %v2744_v60  ;;  %981 = vmatpush.msra.mxu2 %v855_v39  ;;  %v875_v39 = vld [vmem:[%s3391_s4 + $0x128] sm:$0xff] }
 0x13e   :  { %1042 = vmatpush.msrb.mxu3 %v875_v39  ;;  %v874_v39 = vld [vmem:[%s3391_s4 + $0x120] sm:$0xff] }
 0x13f   :  { %737 = vmatmul.f32.gmra.mxu0 %v1734_v36  ;;  %918 = vmatmul.f32.vlgmr.msra.gmra.mxu1 %v774_v46  ;;  %v854_v46 = vld [vmem:[%s3391_s4 + $0x80] sm:$0xff] }
 0x140   :  { %615 = vmatmul.f32.gmra.mxu2 %v2729_v21  ;;  %1043 = vmatpush.msrb.mxu3 %v874_v39  ;;  %v873_v39 = vld [vmem:[%s3391_s4 + $0x118] sm:$0xff] }
 0x141   :  { %982 = vmatpush.msra.mxu2 %v854_v46  ;;  %v2789_v14 = vpop.f32.mrf.mxu2 }
 0x142   :  { %3412 = vst [vmem:[#allocation7_spill] sm:$0xff] %v2789_v14  ;;  %1044 = vmatpush.msrb.mxu3 %v873_v39  ;;  %v872_v39 = vld [vmem:[%s3391_s4 + $0x110] sm:$0xff] }
 0x144   :  { %v2772_v36 = vpop.f32.mrf.mxu3  ;;  %v2774_v21 = vpop.f32.mrf.mxu0  ;;  %1045 = vmatpush.msrb.mxu3 %v872_v39  ;;  %v794_v39 = vmul.f32 %v2353_v20, %v2353_v20 }
 0x145   :  { %3411 = vst [vmem:[#allocation6_spill] sm:$0xff] %v2772_v36  ;;  %668 = vmatmul.f32.gmra.mxu3 %v2772_v36 }
 0x147   :  { %740 = vmatmul.f32.gmra.mxu0 %v1735_v18  ;;  %921 = vmatmul.f32.gmra.mxu1 %v778_v37  ;;  %v782_v37 = vmul.f32 %v2358_v23, %v2358_v23  ;;  %v1736_v18 = vld [vmem:[%s3388_s0 + $0x30] sm:$0xff] }
 0x148   :  { %618 = vmatmul.f32.gmra.mxu2 %v2767_v52  ;;  %v515_v52 = vpop.f32.mrf.mxu1 }
 0x14c   :  { %v2791_v53 = vpop.f32.mrf.mxu3  ;;  %v2793_v46 = vpop.f32.mrf.mxu0 }
 0x14d   :  { %3413 = vst [vmem:[#allocation8_spill] sm:$0xff] %v2791_v53  ;;  %671 = vmatmul.f32.gmra.mxu3 %v2791_v53 }
 0x14f   :  { %743 = vmatmul.f32.gmra.mxu0 %v1736_v18  ;;  %924 = vmatmul.f32.gmra.mxu1 %v782_v37  ;;  %v786_v37 = vmul.f32 %v2382_v33, %v2382_v33  ;;  %v2815_v18 = vpop.f32.mrf.mxu2  ;;  %v890_v33 = vld [vmem:[%s3391_s4 + $0x1a0] sm:$0xff] }
 0x150   :  { %621 = vmatmul.f32.gmra.mxu2 %v2789_v14  ;;  %3415 = vst [vmem:[#allocation10_spill] sm:$0xff] %v2815_v18  ;;  %v1737_v14 = vld [vmem:[%s3388_s0 + $0x38] sm:$0xff]  ;;  %1108 = vmatpush.msrb.mxu0 %v890_v33  ;;  %v518_v6 = vpop.f32.mrf.mxu1  ;;  %v516_v33 = vadd.f32 %v515_v52, %v2648_v49  ;;  %v779_v52 = vmul.f32 %v2419_v45, %v2419_v45 }
 0x151   :  { %v519_v20 = vadd.f32 %v518_v6, %v2675_v27  ;;  %v1740_v27 = vld [vmem:[%s3388_s0 + $0x50] sm:$0xff]  ;;  %v887_v6 = vld [vmem:[%s3391_s4 + $0x188] sm:$0xff] }
 0x154   :  { %v2808_v23 = vpop.f32.mrf.mxu3  ;;  %v2810_v53 = vpop.f32.mrf.mxu0 }
 0x155   :  { %3414 = vst [vmem:[#allocation9_spill] sm:$0xff] %v2808_v23  ;;  %674 = vmatmul.f32.gmra.mxu3 %v2808_v23 }
 0x157   :  { %746 = vmatmul.f32.gmra.mxu0 %v1737_v14  ;;  %927 = vmatmul.f32.gmra.mxu1 %v786_v37  ;;  %v790_v14 = vmul.f32 %v2329_v11, %v2329_v11  ;;  %v775_v37 = vmul.f32 %v2406_v42, %v2406_v42  ;;  %v889_v11 = vld [vmem:[%s3391_s4 + $0x198] sm:$0xff]  ;;  %v871_v42 = vld [vmem:[%s3391_s4 + $0x108] sm:$0xff] }
 0x158   :  { %624 = vmatmul.f32.gmra.mxu2 %v2815_v18  ;;  %v1738_v18 = vld [vmem:[%s3388_s0 + $0x40] sm:$0xff]  ;;  %1109 = vmatpush.msrb.mxu0 %v889_v11  ;;  %v521_v49 = vpop.f32.mrf.mxu1  ;;  %v888_v11 = vld [vmem:[%s3391_s4 + $0x190] sm:$0xff] }
 0x159   :  { %1046 = vmatpush.msrb.mxu3 %v871_v42 }
 0x15a   :  { %1110 = vmatpush.msrb.mxu0 %v888_v11 }
 0x15b   :  { %1047 = vmatpush.msrb.mxu3 %v870_v7  ;;  %v798_v7 = vmul.f32 %v2377_v31, %v2377_v31  ;;  %v522_v31 = vadd.f32 %v521_v49, %v2694_v47  ;;  %v886_v47 = vld [vmem:[%s3391_s4 + $0x180] sm:$0xff] }
 0x15c   :  { %v2827_v23 = vpop.f32.mrf.mxu3  ;;  %v2829_v36 = vpop.f32.mrf.mxu0  ;;  %1111 = vmatpush.msrb.mxu0 %v887_v6 }
 0x15d   :  { %3416 = vst [vmem:[#allocation11_spill] sm:$0xff] %v2827_v23  ;;  %677 = vmatmul.f32.gmra.mxu3 %v2827_v23 }
 0x15e   :  { %1112 = vmatpush.msrb.mxu0 %v886_v47 }
 0x15f   :  { %749 = vmatmul.f32.gmra.mxu0 %v1738_v18  ;;  %930 = vmatmul.f32.gmra.mxu1 %v790_v14 }
 0x160   :  { %983 = vmatmul.f32.vlgmr.msra.gmra.mxu2 %v775_v37 }
 0x163   :  { %v580_v23 = vpop.f32.mrf.mxu2 }
 0x164   :  { %v2849_v18 = vadd.f32 %v580_v23, %v516_v33  ;;  %v2851_v14 = vpop.f32.mrf.mxu3  ;;  %v2853_v37 = vpop.f32.mrf.mxu0  ;;  %v1739_v23 = vld [vmem:[%s3388_s0 + $0x48] sm:$0xff] }
 0x165   :  { %3417 = vst [vmem:[#allocation12_spill] sm:$0xff] %v2851_v14  ;;  %680 = vmatmul.f32.gmra.mxu3 %v2851_v14 }
 0x167   :  { %752 = vmatmul.f32.gmra.mxu0 %v1739_v23  ;;  %933 = vmatmul.f32.gmra.mxu1 %v794_v39  ;;  %v783_v39 = vmul.f32 %v2434_v51, %v2434_v51 }
 0x168   :  { %986 = vmatmul.f32.gmra.mxu2 %v779_v52  ;;  %v524_v52 = vpop.f32.mrf.mxu1 }
 0x16b   :  { %v583_v33 = vpop.f32.mrf.mxu2 }
 0x16c   :  { %v2870_v42 = vadd.f32 %v583_v33, %v519_v20  ;;  %v2872_v14 = vpop.f32.mrf.mxu3  ;;  %v2874_v45 = vpop.f32.mrf.mxu0  ;;  %v802_v33 = vmul.f32 %v2401_v40, %v2401_v40  ;;  %v525_v40 = vadd.f32 %v524_v52, %v2719_v63  ;;  %v776_v52 = vmul.f32 %v2464_v62, %v2464_v62 }
 0x16d   :  { %683 = vmatmul.f32.gmra.mxu3 %v2872_v14 }
 0x16f   :  { %755 = vmatmul.f32.gmra.mxu0 %v1740_v27  ;;  %936 = vmatmul.f32.gmra.mxu1 %v798_v7  ;;  %v787_v7 = vmul.f32 %v2449_v57, %v2449_v57 }
 0x170   :  { %989 = vmatmul.f32.gmra.mxu2 %v783_v39  ;;  %v1741_v39 = vld [vmem:[%s3388_s0 + $0x58] sm:$0xff]  ;;  %v527_v49 = vpop.f32.mrf.mxu1 }
 0x171   :  { %v528_v63 = vadd.f32 %v527_v49, %v2746_v54  ;;  %v1743_v54 = vld [vmem:[%s3388_s0 + $0x68] sm:$0xff] }
 0x173   :  { %v586_v23 = vpop.f32.mrf.mxu2 }
 0x174   :  { %v2888_v11 = vadd.f32 %v586_v23, %v522_v31  ;;  %v2890_v20 = vpop.f32.mrf.mxu3  ;;  %v2892_v51 = vpop.f32.mrf.mxu0  ;;  %v806_v23 = vmul.f32 %v2417_v44, %v2417_v44 }
 0x175   :  { %686 = vmatmul.f32.gmra.mxu3 %v2890_v20 }
 0x177   :  { %758 = vmatmul.f32.gmra.mxu0 %v1741_v39  ;;  %939 = vmatmul.f32.gmra.mxu1 %v802_v33  ;;  %v791_v33 = vmul.f32 %v2423_v48, %v2423_v48  ;;  %v810_v48 = vmul.f32 %v2432_v50, %v2432_v50  ;;  %v780_v50 = vmul.f32 %v2486_v8, %v2486_v8 }
 0x178   :  { %992 = vmatmul.f32.gmra.mxu2 %v787_v7  ;;  %v1742_v7 = vld [vmem:[%s3388_s0 + $0x60] sm:$0xff]  ;;  %v530_v39 = vpop.f32.mrf.mxu1 }
 0x17b   :  { %v589_v27 = vpop.f32.mrf.mxu2 }
 0x17c   :  { %v2906_v6 = vadd.f32 %v589_v27, %v525_v40  ;;  %v2908_v31 = vpop.f32.mrf.mxu3  ;;  %v2910_v57 = vpop.f32.mrf.mxu0  ;;  %v795_v27 = vmul.f32 %v2445_v1, %v2445_v1 }
 0x17d   :  { %689 = vmatmul.f32.gmra.mxu3 %v2908_v31 }
 0x17f   :  { %761 = vmatmul.f32.gmra.mxu0 %v1742_v7  ;;  %942 = vmatmul.f32.gmra.mxu1 %v806_v23  ;;  %v531_v23 = vadd.f32 %v530_v39, %v2774_v21  ;;  %v1744_v21 = vld [vmem:[%s3388_s0 + $0x70] sm:$0xff] }
 0x180   :  { %995 = vmatmul.f32.gmra.mxu2 %v791_v33 }
 0x183   :  { %v592_v47 = vpop.f32.mrf.mxu2 }
 0x184   :  { %v2923_v44 = vadd.f32 %v592_v47, %v528_v63  ;;  %v2925_v40 = vpop.f32.mrf.mxu0  ;;  %v814_v63 = vmul.f32 %v2447_v56, %v2447_v56  ;;  %v799_v47 = vmul.f32 %v2460_v59, %v2460_v59  ;;  %v784_v56 = vmul.f32 %v2499_v13, %v2499_v13 }
 0x185   :  { %1048 = vmatmul.f32.vlgmr.msrb.gmra.mxu3 %v776_v52  ;;  %v533_v52 = vpop.f32.mrf.mxu1 }
 0x186   :  { %v534_v39 = vadd.f32 %v533_v52, %v2793_v46  ;;  %v1745_v46 = vld [vmem:[%s3388_s0 + $0x78] sm:$0xff] }
 0x187   :  { %764 = vmatmul.f32.gmra.mxu0 %v1743_v54  ;;  %945 = vmatmul.f32.gmra.mxu1 %v810_v48  ;;  %v818_v54 = vmul.f32 %v2462_v61, %v2462_v61  ;;  %v788_v61 = vmul.f32 %v2517_v19, %v2517_v19  ;;  %v1514_v52 = vld [vmem:[%s3392_s6 + $0x78] sm:$0xff]  ;;  %v807_v19 = vmul.f32 %v2503_v28, %v2503_v28  ;;  %v1513_v28 = vld [vmem:[%s3392_s6 + $0x70] sm:$0xff] }
 0x188   :  { %998 = vmatmul.f32.gmra.mxu2 %v795_v27  ;;  %v645_v62 = vpop.f32.mrf.mxu3 }
 0x189   :  { %v2935_v49 = vadd.f32 %v645_v62, %v2849_v18  ;;  %v803_v62 = vmul.f32 %v2484_v4, %v2484_v4  ;;  %1515 = vmatpush.msrb.mxu2 %v1514_v52 }
 0x18b   :  { %v595_v33 = vpop.f32.mrf.mxu2  ;;  %1516 = vmatpush.msrb.mxu2 %v1513_v28 }
 0x18c   :  { %v2940_v7 = vadd.f32 %v595_v33, %v531_v23  ;;  %v2942_v1 = vpop.f32.mrf.mxu0 }
 0x18d   :  { %1051 = vmatmul.f32.gmra.mxu3 %v780_v50  ;;  %v536_v23 = vpop.f32.mrf.mxu1 }
 0x18e   :  { %v537_v50 = vadd.f32 %v536_v23, %v2810_v53 }
 0x18f   :  { %767 = vmatmul.f32.gmra.mxu0 %v1744_v21  ;;  %948 = vmatmul.f32.gmra.mxu1 %v814_v63  ;;  %v1417_v21 = vld [vmem:[%s3393_s5 + $0x78] sm:$0xff] }
 0x190   :  { %1001 = vmatmul.f32.gmra.mxu2 %v799_v47  ;;  %v648_v8 = vpop.f32.mrf.mxu3  ;;  %v822_v47 = vmul.f32 %v2479_v2, %v2479_v2  ;;  %1418 = vmatpush.msrb.mxu1 %v1417_v21  ;;  %v792_v2 = vmul.f32 %v2490_v12, %v2490_v12 }
 0x191   :  { %v2952_v18 = vadd.f32 %v648_v8, %v2870_v42 }
 0x193   :  { %v598_v48 = vpop.f32.mrf.mxu2 }
 0x194   :  { %v2957_v27 = vadd.f32 %v598_v48, %v534_v39  ;;  %v2959_v59 = vpop.f32.mrf.mxu0  ;;  %v826_v39 = vmul.f32 %v2497_v10, %v2497_v10 }
 0x195   :  { %1054 = vmatmul.f32.gmra.mxu3 %v784_v56  ;;  %v781_v56 = vmul.f32 %v2584_v55, %v2584_v55  ;;  %v796_v55 = vmul.f32 %v2510_v17, %v2510_v17 }
 0x197   :  { %770 = vmatmul.f32.gmra.mxu0 %v1745_v46  ;;  %951 = vmatmul.f32.gmra.mxu1 %v818_v54  ;;  %v1416_v54 = vld [vmem:[%s3393_s5 + $0x70] sm:$0xff]  ;;  %v830_v46 = vmul.f32 %v2512_v16, %v2512_v16 }
 0x198   :  { %1004 = vmatmul.f32.gmra.mxu2 %v803_v62  ;;  %v651_v13 = vpop.f32.mrf.mxu3  ;;  %v539_v62 = vpop.f32.mrf.mxu1  ;;  %1419 = vmatpush.msrb.mxu1 %v1416_v54 }
 0x199   :  { %v2969_v42 = vadd.f32 %v651_v13, %v2888_v11  ;;  %v777_v11 = vmul.f32 %v2555_v35, %v2555_v35  ;;  %v785_v13 = vmul.f32 %v2615_v22, %v2615_v22  ;;  %v800_v22 = vmul.f32 %v2534_v25, %v2534_v25 }
 0x19a   :  { %v540_v54 = vadd.f32 %v539_v62, %v2829_v36  ;;  %v812_v36 = vmul.f32 %v2641_v41, %v2641_v41  ;;  %v1411_v41 = vld [vmem:[%s3393_s5 + $0x48] sm:$0xff] }
 0x19b   :  { %v601_v33 = vpop.f32.mrf.mxu2 }
 0x19c   :  { %v2974_v63 = vadd.f32 %v601_v33, %v537_v50  ;;  %v2976_v4 = vpop.f32.mrf.mxu0  ;;  %v1415_v50 = vld [vmem:[%s3393_s5 + $0x68] sm:$0xff] }
 0x19d   :  { %1057 = vmatmul.f32.gmra.mxu3 %v788_v61  ;;  %1420 = vmatpush.msrb.mxu1 %v1415_v50 }
 0x19f   :  { %954 = vmatmul.f32.gmra.mxu1 %v822_v47  ;;  %1113 = vmatmul.f32.vlgmr.msrb.gmra.mxu0 %v777_v11  ;;  %v834_v47 = vmul.f32 %v2536_v26, %v2536_v26  ;;  %v789_v11 = vmul.f32 %v2646_v43, %v2646_v43  ;;  %v804_v26 = vmul.f32 %v2561_v38, %v2561_v38  ;;  %v1413_v38 = vld [vmem:[%s3393_s5 + $0x58] sm:$0xff] }
 0x1a0   :  { %1007 = vmatmul.f32.gmra.mxu2 %v807_v19  ;;  %v654_v53 = vpop.f32.mrf.mxu3  ;;  %v542_v33 = vpop.f32.mrf.mxu1  ;;  %v1414_v19 = vld [vmem:[%s3393_s5 + $0x60] sm:$0xff] }
 0x1a1   :  { %v2991_v8 = vadd.f32 %v654_v53, %v2906_v6  ;;  %v811_v6 = vmul.f32 %v2532_v24, %v2532_v24  ;;  %v1512_v24 = vld [vmem:[%s3392_s6 + $0x68] sm:$0xff]  ;;  %1421 = vmatpush.msrb.mxu1 %v1414_v19 }
 0x1a2   :  { %1517 = vmatpush.msrb.mxu2 %v1512_v24 }
 0x1a3   :  { %v3006_v12 = vpop.f32.mrf.mxu2  ;;  %1422 = vmatpush.msrb.mxu1 %v1413_v38  ;;  %v3420_v38 = vld [vmem:[#allocation6_spill] sm:$0xff] }
 0x1a4   :  { %v2995_v35 = vpop.f32.mrf.mxu0 }
 0x1a5   :  { %1060 = vmatmul.f32.gmra.mxu3 %v792_v2  ;;  %v793_v2 = vmul.f32 %v2673_v15, %v2673_v15  ;;  %v808_v15 = vmul.f32 %v2600_v0, %v2600_v0  ;;  %v605_v0 = vadd.f32 %v3006_v12, %v540_v54  ;;  %v801_v12 = vmul.f32 %v2717_v58, %v2717_v58 }
 0x1a6   :  { %v816_v58 = vmul.f32 %v2671_v9, %v2671_v9  ;;  %v1410_v9 = vld [vmem:[%s3393_s5 + $0x40] sm:$0xff] }
 0x1a7   :  { %957 = vmatmul.f32.gmra.mxu1 %v826_v39  ;;  %1116 = vmatmul.f32.gmra.mxu0 %v781_v56 }
 0x1a8   :  { %1010 = vmatmul.f32.gmra.mxu2 %v811_v6  ;;  %v657_v48 = vpop.f32.mrf.mxu3  ;;  %v545_v28 = vpop.f32.mrf.mxu1 }
 0x1a9   :  { %v3012_v10 = vadd.f32 %v657_v48, %v2923_v44  ;;  %v815_v44 = vmul.f32 %v2553_v34, %v2553_v34  ;;  %v1511_v34 = vld [vmem:[%s3392_s6 + $0x60] sm:$0xff]  ;;  %v797_v48 = vmul.f32 %v2692_v32, %v2692_v32 }
 0x1aa   :  { %1518 = vmatpush.msrb.mxu2 %v1511_v34 }
 0x1ab   :  { %v607_v16 = vpop.f32.mrf.mxu2 }
 0x1ac   :  { %v3016_v23 = vpop.f32.mrf.mxu0 }
 0x1ad   :  { %1063 = vmatmul.f32.gmra.mxu3 %v796_v55 }
 0x1af   :  { %960 = vmatmul.f32.gmra.mxu1 %v830_v46  ;;  %1119 = vmatmul.f32.gmra.mxu0 %v785_v13  ;;  %v1412_v46 = vld [vmem:[%s3393_s5 + $0x50] sm:$0xff] }
 0x1b0   :  { %1013 = vmatmul.f32.gmra.mxu2 %v815_v44  ;;  %v660_v17 = vpop.f32.mrf.mxu3  ;;  %v548_v24 = vpop.f32.mrf.mxu1  ;;  %1423 = vmatpush.msrb.mxu1 %v1412_v46  ;;  %v543_v44 = vadd.f32 %v542_v33, %v2853_v37  ;;  %v546_v33 = vadd.f32 %v545_v28, %v2874_v45 }
 0x1b1   :  { %v3031_v61 = vadd.f32 %v660_v17, %v2940_v7  ;;  %v819_v7 = vmul.f32 %v2590_v5, %v2590_v5  ;;  %v1510_v5 = vld [vmem:[%s3392_s6 + $0x58] sm:$0xff]  ;;  %v831_v17 = vmul.f32 %v2690_v29, %v2690_v29  ;;  %v1507_v29 = vld [vmem:[%s3392_s6 + $0x40] sm:$0xff] }
 0x1b2   :  { %1519 = vmatpush.msrb.mxu2 %v1510_v5  ;;  %v608_v50 = vadd.f32 %v607_v16, %v543_v44  ;;  %1424 = vmatpush.msrb.mxu1 %v1411_v41  ;;  %v805_v16 = vmul.f32 %v2744_v60, %v2744_v60  ;;  %v3419_v60 = vld [vmem:[#allocation2_spill] sm:$0xff] }
 0x1b3   :  { %v610_v43 = vpop.f32.mrf.mxu2  ;;  %v820_v45 = vmul.f32 %v3419_v60, %v3419_v60  ;;  %v3425_v60 = vld [vmem:[#allocation7_spill] sm:$0xff] }
 0x1b4   :  { %v3035_v52 = vpop.f32.mrf.mxu0  ;;  %v611_v19 = vadd.f32 %v610_v43, %v546_v33  ;;  %1425 = vmatpush.msrb.mxu1 %v1410_v9  ;;  %v1506_v43 = vld [vmem:[%s3392_s6 + $0x38] sm:$0xff] }
 0x1b5   :  { %1066 = vmatmul.f32.gmra.mxu3 %v800_v22 }
 0x1b7   :  { %963 = vmatmul.f32.gmra.mxu1 %v834_v47  ;;  %1122 = vmatmul.f32.gmra.mxu0 %v789_v11 }
 0x1b8   :  { %1016 = vmatmul.f32.gmra.mxu2 %v819_v7  ;;  %v663_v25 = vpop.f32.mrf.mxu3  ;;  %v551_v47 = vpop.f32.mrf.mxu1  ;;  %v3418_v7 = vld [vmem:[#allocation3_spill] sm:$0xff] }
 0x1b9   :  { %v3050_v53 = vadd.f32 %v663_v25, %v2957_v27  ;;  %v823_v27 = vmul.f32 %v2629_v30, %v2629_v30  ;;  %v1509_v30 = vld [vmem:[%s3392_s6 + $0x50] sm:$0xff]  ;;  %v835_v25 = vmul.f32 %v3418_v7, %v3418_v7 }
 0x1ba   :  { %1520 = vmatpush.msrb.mxu2 %v1509_v30 }
 0x1bb   :  { %v613_v55 = vpop.f32.mrf.mxu2 }
 0x1bc   :  { %v3054_v21 = vpop.f32.mrf.mxu0 }
 0x1bd   :  { %1069 = vmatmul.f32.gmra.mxu3 %v804_v26 }
 0x1bf   :  { %1125 = vmatmul.f32.gmra.mxu0 %v793_v2 }
 0x1c0   :  { %1019 = vmatmul.f32.gmra.mxu2 %v823_v27  ;;  %v666_v39 = vpop.f32.mrf.mxu3  ;;  %v554_v28 = vpop.f32.mrf.mxu1 }
 0x1c1   :  { %v3067_v56 = vadd.f32 %v666_v39, %v2974_v63  ;;  %v827_v63 = vmul.f32 %v2669_v3, %v2669_v3  ;;  %v1508_v3 = vld [vmem:[%s3392_s6 + $0x48] sm:$0xff]  ;;  %v809_v39 = vmul.f32 %v3420_v38, %v3420_v38 }
 0x1c2   :  { %1521 = vmatpush.msrb.mxu2 %v1508_v3  ;;  %v552_v3 = vadd.f32 %v551_v47, %v2910_v57  ;;  %v1504_v57 = vld [vmem:[%s3392_s6 + $0x28] sm:$0xff]  ;;  %v3424_v47 = vld [vmem:[#allocation9_spill] sm:$0xff] }
 0x1c3   :  { %v616_v22 = vpop.f32.mrf.mxu2 }
 0x1c4   :  { %v3071_v6 = vpop.f32.mrf.mxu0  ;;  %1522 = vmatpush.msrb.mxu2 %v1507_v29  ;;  %v617_v44 = vadd.f32 %v616_v22, %v552_v3  ;;  %v817_v22 = vmul.f32 %v3424_v47, %v3424_v47 }
 0x1c5   :  { %1072 = vmatmul.f32.gmra.mxu3 %v808_v15  ;;  %v549_v15 = vadd.f32 %v548_v24, %v2892_v51  ;;  %v1505_v51 = vld [vmem:[%s3392_s6 + $0x30] sm:$0xff] }
 0x1c6   :  { %1523 = vmatpush.msrb.mxu2 %v1506_v43 }
 0x1c7   :  { %1128 = vmatmul.f32.gmra.mxu0 %v797_v48  ;;  %v614_v30 = vadd.f32 %v613_v55, %v549_v15  ;;  %v1409_v48 = vld [vmem:[%s3393_s5 + $0x38] sm:$0xff]  ;;  %v3422_v55 = vld [vmem:[#allocation8_spill] sm:$0xff]  ;;  %v1406_v15 = vld [vmem:[%s3393_s5 + $0x20] sm:$0xff] }
 0x1c8   :  { %1022 = vmatmul.f32.gmra.mxu2 %v827_v63  ;;  %v669_v13 = vpop.f32.mrf.mxu3  ;;  %1426 = vmatpush.msrb.mxu1 %v1409_v48  ;;  %v813_v24 = vmul.f32 %v3422_v55, %v3422_v55 }
 0x1c9   :  { %v3085_v32 = vadd.f32 %v669_v13, %v605_v0  ;;  %v3421_v0 = vld [vmem:[#allocation4_spill] sm:$0xff]  ;;  %1524 = vmatpush.msrb.mxu2 %v1505_v51 }
 0x1ca   :  { %v824_v46 = vmul.f32 %v3421_v0, %v3421_v0 }
 0x1cb   :  { %v619_v2 = vpop.f32.mrf.mxu2  ;;  %1525 = vmatpush.msrb.mxu2 %v1504_v57  ;;  %v829_v57 = vmul.f32 %v2872_v14, %v2872_v14  ;;  %v1501_v14 = vld [vmem:[%s3392_s6 + $0x10] sm:$0xff] }
 0x1cc   :  { %v3089_v62 = vpop.f32.mrf.mxu0 }
 0x1cd   :  { %1075 = vmatmul.f32.gmra.mxu3 %v812_v36 }
 0x1cf   :  { %1131 = vmatmul.f32.gmra.mxu0 %v801_v12  ;;  %v557_v12 = vpop.f32.mrf.mxu1 }
 0x1d0   :  { %1025 = vmatmul.f32.gmra.mxu2 %v831_v17  ;;  %v672_v34 = vpop.f32.mrf.mxu3  ;;  %v1408_v17 = vld [vmem:[%s3393_s5 + $0x30] sm:$0xff]  ;;  %v558_v38 = vadd.f32 %v557_v12, %v2942_v1  ;;  %v1502_v1 = vld [vmem:[%s3392_s6 + $0x18] sm:$0xff] }
 0x1d1   :  { %v3102_v11 = vadd.f32 %v672_v34, %v608_v50  ;;  %1427 = vmatpush.msrb.mxu1 %v1408_v17  ;;  %v3423_v34 = vld [vmem:[#allocation5_spill] sm:$0xff] }
 0x1d3   :  { %v622_v13 = vpop.f32.mrf.mxu2 }
 0x1d4   :  { %v3106_v37 = vpop.f32.mrf.mxu0 }
 0x1d5   :  { %1078 = vmatmul.f32.gmra.mxu3 %v816_v58  ;;  %v828_v58 = vmul.f32 %v3423_v34, %v3423_v34 }
 0x1d7   :  { %1134 = vmatmul.f32.gmra.mxu0 %v805_v16  ;;  %v555_v16 = vadd.f32 %v554_v28, %v2925_v40  ;;  %v560_v7 = vpop.f32.mrf.mxu1  ;;  %v1503_v40 = vld [vmem:[%s3392_s6 + $0x20] sm:$0xff]  ;;  %v3426_v28 = vld [vmem:[#allocation11_spill] sm:$0xff] }
 0x1d8   :  { %1028 = vmatmul.f32.gmra.mxu2 %v835_v25  ;;  %v675_v26 = vpop.f32.mrf.mxu3  ;;  %v561_v3 = vadd.f32 %v560_v7, %v2959_v59  ;;  %v833_v59 = vmul.f32 %v2890_v20, %v2890_v20  ;;  %v837_v20 = vmul.f32 %v2908_v31, %v2908_v31  ;;  %v1402_v31 = vld [vmem:[%s3393_s5] sm:$0xff] }
 0x1d9   :  { %v3119_v5 = vadd.f32 %v675_v26, %v611_v19  ;;  %v620_v25 = vadd.f32 %v619_v2, %v555_v16  ;;  %v1407_v19 = vld [vmem:[%s3393_s5 + $0x28] sm:$0xff]  ;;  %v821_v2 = vmul.f32 %v3426_v28, %v3426_v28  ;;  %1526 = vmatpush.msrb.mxu2 %v1503_v40 }
 0x1da   :  { %1428 = vmatpush.msrb.mxu1 %v1407_v19  ;;  %v1403_v40 = vld [vmem:[%s3393_s5 + $0x8] sm:$0xff] }
 0x1db   :  { %v625_v33 = vpop.f32.mrf.mxu2  ;;  %1527 = vmatpush.msrb.mxu2 %v1502_v1 }
 0x1dc   :  { %v3123_v27 = vpop.f32.mrf.mxu0  ;;  %1429 = vmatpush.msrb.mxu1 %v1406_v15  ;;  %v626_v12 = vadd.f32 %v625_v33, %v561_v3 }
 0x1dd   :  { %1081 = vmatmul.f32.gmra.mxu3 %v820_v45  ;;  %v832_v45 = vmul.f32 %v3425_v60, %v3425_v60  ;;  %1528 = vmatpush.msrb.mxu2 %v1501_v14 }
 0x1df   :  { %1137 = vmatmul.f32.gmra.mxu0 %v809_v39  ;;  %v623_v39 = vadd.f32 %v622_v13, %v558_v38  ;;  %v3428_v13 = vld [vmem:[#allocation12_spill] sm:$0xff] }
 0x1e0   :  { %v678_v54 = vpop.f32.mrf.mxu3 }
 0x1e1   :  { %v3134_v63 = vadd.f32 %v678_v54, %v614_v30  ;;  %v919_v54 = vpop.f32.mrf.mxu1 }
 0x1e3   :  { %v984_v30 = vpop.f32.mrf.mxu2 }
 0x1e4   :  { %v3138_v36 = vpop.f32.mrf.mxu0  ;;  %v985_v38 = vadd.f32 %v984_v30, %v919_v54 }
 0x1e5   :  { %1084 = vmatmul.f32.gmra.mxu3 %v824_v46  ;;  %v3427_v46 = vld [vmem:[#allocation10_spill] sm:$0xff] }
 0x1e6   :  { %v836_v51 = vmul.f32 %v3427_v46, %v3427_v46 }
 0x1e7   :  { %1140 = vmatmul.f32.gmra.mxu0 %v813_v24  ;;  %v825_v24 = vmul.f32 %v3428_v13, %v3428_v13 }
 0x1e8   :  { %v681_v50 = vpop.f32.mrf.mxu3 }
 0x1e9   :  { %v3149_v41 = vadd.f32 %v681_v50, %v617_v44  ;;  %v922_v34 = vpop.f32.mrf.mxu1 }
 0x1eb   :  { %v987_v50 = vpop.f32.mrf.mxu2 }
 0x1ec   :  { %v3153_v29 = vpop.f32.mrf.mxu0 }
 0x1ed   :  { %1087 = vmatmul.f32.gmra.mxu3 %v828_v58 }
 0x1ef   :  { %1143 = vmatmul.f32.gmra.mxu0 %v817_v22 }
 0x1f0   :  { %v684_v9 = vpop.f32.mrf.mxu3 }
 0x1f1   :  { %v3164_v26 = vadd.f32 %v684_v9, %v620_v25  ;;  %v925_v33 = vpop.f32.mrf.mxu1  ;;  %v1405_v25 = vld [vmem:[%s3393_s5 + $0x18] sm:$0xff]  ;;  %v1404_v9 = vld [vmem:[%s3393_s5 + $0x10] sm:$0xff] }
 0x1f2   :  { %1430 = vmatpush.msrb.mxu1 %v1405_v25 }
 0x1f3   :  { %v990_v22 = vpop.f32.mrf.mxu2 }
 0x1f4   :  { %v3168_v43 = vpop.f32.mrf.mxu0  ;;  %1431 = vmatpush.msrb.mxu1 %v1404_v9 }
 0x1f5   :  { %1090 = vmatmul.f32.gmra.mxu3 %v832_v45  ;;  %v1500_v45 = vld [vmem:[%s3392_s6 + $0x8] sm:$0xff] }
 0x1f6   :  { %1529 = vmatpush.msrb.mxu2 %v1500_v45  ;;  %1432 = vmatpush.msrb.mxu1 %v1403_v40 }
 0x1f7   :  { %1146 = vmatmul.f32.gmra.mxu0 %v821_v2 }
 0x1f8   :  { %v687_v48 = vpop.f32.mrf.mxu3  ;;  %1433 = vmatpush.msrb.mxu1 %v1402_v31 }
 0x1f9   :  { %v3179_v0 = vadd.f32 %v687_v48, %v623_v39  ;;  %v928_v28 = vpop.f32.mrf.mxu1  ;;  %v1499_v39 = vld [vmem:[%s3392_s6] sm:$0xff] }
 0x1fa   :  { %1530 = vmatpush.msrb.mxu2 %v1499_v39 }
 0x1fb   :  { %v993_v60 = vpop.f32.mrf.mxu2 }
 0x1fc   :  { %v3183_v55 = vpop.f32.mrf.mxu0 }
 0x1fd   :  { %1093 = vmatmul.f32.gmra.mxu3 %v836_v51  ;;  %v1178_v51 = vmul.f32 %v2976_v4, %v2976_v4 }
 0x1ff   :  { %1149 = vmatmul.f32.gmra.mxu0 %v825_v24 }
 0x200   :  { %v690_v44 = vpop.f32.mrf.mxu3 }
 0x201   :  { %v3191_v17 = vadd.f32 %v690_v44, %v626_v12  ;;  %v931_v3 = vpop.f32.mrf.mxu1  ;;  %v988_v12 = vadd.f32 %v987_v50, %v922_v34 }
 0x203   :  { %3429 = vst [vmem:[#allocation3_spill] sm:$0xff] %v3191_v17  ;;  %v996_v13 = vpop.f32.mrf.mxu2 }
 0x204   :  { %v3193_v58 = vpop.f32.mrf.mxu0 }
 0x207   :  { %1152 = vmatmul.f32.gmra.mxu0 %v829_v57 }
 0x208   :  { %v1049_v47 = vpop.f32.mrf.mxu3 }
 0x209   :  { %v1050_v15 = vadd.f32 %v1049_v47, %v985_v38  ;;  %v1179_v47 = vmul.f32 %v2995_v35, %v2995_v35  ;;  %v3232_v31 = vpop.f32.mrf.mxu1 }
 0x20b   :  { %v3230_v40 = vpop.f32.mrf.mxu2 }
 0x20c   :  { %v3197_v16 = vpop.f32.mrf.mxu0 }
 0x20f   :  { %1155 = vmatmul.f32.gmra.mxu0 %v833_v59 }
 0x210   :  { %v1052_v7 = vpop.f32.mrf.mxu3 }
 0x211   :  { %v1053_v57 = vadd.f32 %v1052_v7, %v988_v12 }
 0x214   :  { %v3204_v19 = vpop.f32.mrf.mxu0 }
 0x217   :  { %1158 = vmatmul.f32.gmra.mxu0 %v837_v20  ;;  %v991_v20 = vadd.f32 %v990_v22, %v925_v33  ;;  %v994_v22 = vadd.f32 %v993_v60, %v928_v28  ;;  %v1181_v60 = vmul.f32 %v3035_v52, %v3035_v52 }
 0x218   :  { %v1055_v2 = vpop.f32.mrf.mxu3 }
 0x219   :  { %v1056_v38 = vadd.f32 %v1055_v2, %v991_v20 }
 0x21c   :  { %v1114_v48 = vpop.f32.mrf.mxu0 }
 0x21d   :  { %v1115_v46 = vadd.f32 %v1114_v48, %v1050_v15 }
 0x21f   :  { %v1162_v1 = vmul.f32 0.03125, %v1115_v46  ;;  %v1180_v46 = vmul.f32 %v3016_v23, %v3016_v23 }
 0x220   :  { %v1058_v24 = vpop.f32.mrf.mxu3 }
 0x221   :  { %v1194_v44 = vsub.f32 %v1162_v1, %v1178_v51 }
 0x223   :  { %v1210_v30 = vmax.f32 %v1194_v44, 0.0 }
 0x224   :  { %v1117_v54 = vpop.f32.mrf.mxu0 }
 0x225   :  { %v1226_v59 = vadd.f32 1e-05, %v1210_v30  ;;  %v1118_v25 = vadd.f32 %v1117_v54, %v1053_v57  ;;  %v1059_v57 = vadd.f32 %v1058_v24, %v994_v22  ;;  %v3236_v54 = vpop.f32.mrf.mxu2 }
 0x227   :  { %1702 = vrsqrt.f32 %v1226_v59  ;;  %v1163_v14 = vmul.f32 0.03125, %v1118_v25  ;;  %vm1248_vm1 = vweird.f32 %v1226_v59 }
 0x228   :  { %v1061_v9 = vpop.f32.mrf.mxu3 }
 0x229   :  { %v1195_v45 = vsub.f32 %v1163_v14, %v1179_v47  ;;  %v3238_v14 = vpop.f32.mrf.mxu1 }
 0x22b   :  { %v1211_v50 = vmax.f32 %v1195_v45, 0.0 }
 0x22c   :  { %v1120_v34 = vpop.f32.mrf.mxu0 }
 0x22d   :  { %v1703_v7 = vpop.eup %1702  ;;  %v1227_v39 = vadd.f32 1e-05, %v1211_v50  ;;  %v1121_v15 = vadd.f32 %v1120_v34, %v1056_v38 }
 0x22e   :  { %v1243_v48 = vmul.f32 %v1703_v7, %v1226_v59  ;;  %vm1249_vm0 = vweird.f32 %v1703_v7 }
 0x22f   :  { %1704 = vrsqrt.f32 %v1227_v39  ;;  %v1164_v51 = vmul.f32 0.03125, %v1121_v15  ;;  %vm1250_vm2 = vmor %vm1248_vm1, %vm1249_vm0  ;;  %vm1258_vm4 = vweird.f32 %v1227_v39 }
 0x230   :  { %v1244_v1 = vmul.f32 %v1703_v7, %v1243_v48  ;;  %v1064_v12 = vpop.f32.mrf.mxu3  ;;  %v997_v48 = vadd.f32 %v996_v13, %v931_v3  ;;  %v1182_v13 = vmul.f32 %v3054_v21, %v3054_v21 }
 0x231   :  { %v1196_v33 = vsub.f32 %v1164_v51, %v1180_v46  ;;  %v940_v3 = vpop.f32.mrf.mxu1 }
 0x232   :  { %v1245_v44 = vmul.f32 0.5, %v1244_v1  ;;  %v1062_v22 = vadd.f32 %v1061_v9, %v997_v48 }
 0x233   :  { %v1212_v30 = vmax.f32 %v1196_v33, 0.0 }
 0x234   :  { %v1246_v2 = vsub.f32 1.5, %v1245_v44  ;;  %v1123_v25 = vpop.f32.mrf.mxu0 }
 0x235   :  { %v1705_v47 = vpop.eup %1704  ;;  %v1228_v20 = vadd.f32 1e-05, %v1212_v30  ;;  %v1124_v45 = vadd.f32 %v1123_v25, %v1059_v57  ;;  %v1005_v25 = vpop.f32.mrf.mxu2 }
 0x236   :  { %v1253_v38 = vmul.f32 %v1705_v47, %v1227_v39  ;;  %v1247_v50 = vmul.f32 %v1703_v7, %v1246_v2  ;;  %vm1259_vm3 = vweird.f32 %v1705_v47 }
 0x237   :  { %1706 = vrsqrt.f32 %v1228_v20  ;;  %v1165_v28 = vmul.f32 0.03125, %v1124_v45  ;;  %vm1260_vm5 = vmor %vm1258_vm4, %vm1259_vm3  ;;  %vm1268_vm7 = vweird.f32 %v1228_v20 }
 0x238   :  { %v1067_v24 = vpop.f32.mrf.mxu3  ;;  %v1251_v34 = vsel %vm1250_vm2, %v1703_v7, %v1247_v50  ;;  %v1254_v15 = vmul.f32 %v1705_v47, %v1253_v38  ;;  %v1000_v50 = vadd.f32 %v3230_v40, %v3232_v31  ;;  %v1183_v40 = vmul.f32 %v3071_v6, %v3071_v6 }
 0x239   :  { %v1197_v46 = vsub.f32 %v1165_v28, %v1181_v60  ;;  %1434 = vmatmul.f32.vlgmr.msrb.gmra.mxu1 %v1251_v34  ;;  %v1483_v51 = vmul.f32 %v1251_v34, %v2976_v4 }
 0x23a   :  { %v1255_v1 = vmul.f32 0.5, %v1254_v15  ;;  %v1065_v15 = vadd.f32 %v1064_v12, %v1000_v50 }
 0x23b   :  { %v1213_v33 = vmax.f32 %v1197_v46, 0.0  ;;  %1531 = vmatmul.f32.vlgmr.msrb.gmra.mxu2 %v1483_v51 }
 0x23c   :  { %v1126_v59 = vpop.f32.mrf.mxu0  ;;  %v1256_v44 = vsub.f32 1.5, %v1255_v1 }
 0x23d   :  { %v1707_v57 = vpop.eup %1706  ;;  %v1229_v30 = vadd.f32 1e-05, %v1213_v33  ;;  %v1127_v2 = vadd.f32 %v1126_v59, %v1062_v22  ;;  %v943_v59 = vpop.f32.mrf.mxu1 }
 0x23e   :  { %v1263_v45 = vmul.f32 %v1707_v57, %v1228_v20  ;;  %v1257_v17 = vmul.f32 %v1705_v47, %v1256_v44  ;;  %vm1269_vm6 = vweird.f32 %v1707_v57  ;;  %v1003_v44 = vadd.f32 %v3236_v54, %v3238_v14 }
 0x23f   :  { %1708 = vrsqrt.f32 %v1229_v30  ;;  %v1166_v4 = vmul.f32 0.03125, %v1127_v2  ;;  %vm1270_vm8 = vmor %vm1268_vm7, %vm1269_vm6  ;;  %vm1278_vm10 = vweird.f32 %v1229_v30  ;;  %v1184_v54 = vmul.f32 %v3089_v62, %v3089_v62 }
 0x240   :  { %v1070_v9 = vpop.f32.mrf.mxu3  ;;  %v1261_v7 = vsel %vm1260_vm5, %v1705_v47, %v1257_v17  ;;  %v1264_v38 = vmul.f32 %v1707_v57, %v1263_v45  ;;  %v1068_v20 = vadd.f32 %v1067_v24, %v1003_v44  ;;  %v1006_v24 = vadd.f32 %v1005_v25, %v940_v3 }
 0x241   :  { %v1198_v60 = vsub.f32 %v1166_v4, %v1182_v13  ;;  %1437 = vmatmul.f32.gmra.mxu1 %v1261_v7  ;;  %v1484_v28 = vmul.f32 %v1261_v7, %v2995_v35  ;;  %v1008_v35 = vpop.f32.mrf.mxu2  ;;  %v1185_v25 = vmul.f32 %v3106_v37, %v3106_v37 }
 0x242   :  { %v1265_v34 = vmul.f32 0.5, %v1264_v38 }
 0x243   :  { %v1214_v39 = vmax.f32 %v1198_v60, 0.0  ;;  %1534 = vmatmul.f32.gmra.mxu2 %v1484_v28 }
 0x244   :  { %v1129_v48 = vpop.f32.mrf.mxu0  ;;  %v1266_v46 = vsub.f32 1.5, %v1265_v34 }
 0x245   :  { %v1709_v51 = vpop.eup %1708  ;;  %v1230_v1 = vadd.f32 1e-05, %v1214_v39  ;;  %v1130_v22 = vadd.f32 %v1129_v48, %v1065_v15 }
 0x246   :  { %v1273_v33 = vmul.f32 %v1709_v51, %v1229_v30  ;;  %v1267_v17 = vmul.f32 %v1707_v57, %v1266_v46  ;;  %vm1279_vm9 = vweird.f32 %v1709_v51 }
 0x247   :  { %1710 = vrsqrt.f32 %v1230_v1  ;;  %v1167_v31 = vmul.f32 0.03125, %v1130_v22  ;;  %vm1280_vm11 = vmor %vm1278_vm10, %vm1279_vm9  ;;  %vm1288_vm13 = vweird.f32 %v1230_v1 }
 0x248   :  { %v1271_v47 = vsel %vm1270_vm8, %v1707_v57, %v1267_v17  ;;  %v1274_v12 = vmul.f32 %v1709_v51, %v1273_v33  ;;  %v1073_v13 = vpop.f32.mrf.mxu3  ;;  %v946_v17 = vpop.f32.mrf.mxu1 }
 0x249   :  { %v1199_v2 = vsub.f32 %v1167_v31, %v1183_v40  ;;  %1440 = vmatmul.f32.gmra.mxu1 %v1271_v47  ;;  %v1485_v45 = vmul.f32 %v1271_v47, %v3016_v23  ;;  %v1011_v22 = vpop.f32.mrf.mxu2  ;;  %v1071_v40 = vadd.f32 %v1070_v9, %v1006_v24 }
 0x24a   :  { %v1275_v4 = vmul.f32 0.5, %v1274_v12 }
 0x24b   :  { %v1215_v7 = vmax.f32 %v1199_v2, 0.0  ;;  %1537 = vmatmul.f32.gmra.mxu2 %v1485_v45 }
 0x24c   :  { %v1132_v38 = vpop.f32.mrf.mxu0  ;;  %v1276_v50 = vsub.f32 1.5, %v1275_v4 }
 0x24d   :  { %v1711_v60 = vpop.eup %1710  ;;  %v1231_v28 = vadd.f32 1e-05, %v1215_v7  ;;  %v1133_v57 = vadd.f32 %v1132_v38, %v1068_v20  ;;  %v1009_v20 = vadd.f32 %v1008_v35, %v943_v59  ;;  %v1186_v35 = vmul.f32 %v3123_v27, %v3123_v27 }
 0x24e   :  { %v1283_v34 = vmul.f32 %v1711_v60, %v1230_v1  ;;  %v1277_v15 = vmul.f32 %v1709_v51, %v1276_v50  ;;  %vm1289_vm12 = vweird.f32 %v1711_v60 }
 0x24f   :  { %1712 = vrsqrt.f32 %v1231_v28  ;;  %v1168_v14 = vmul.f32 0.03125, %v1133_v57  ;;  %vm1290_vm14 = vmor %vm1288_vm13, %vm1289_vm12  ;;  %v1074_v57 = vadd.f32 %v1073_v13, %v1009_v20  ;;  %vm1298_vm0 = vweird.f32 %v1231_v28 }
 0x250   :  { %v1281_v23 = vsel %vm1280_vm11, %v1709_v51, %v1277_v15  ;;  %v1284_v39 = vmul.f32 %v1711_v60, %v1283_v34  ;;  %v1076_v30 = vpop.f32.mrf.mxu3 }
 0x251   :  { %v1200_v48 = vsub.f32 %v1168_v14, %v1184_v54  ;;  %1443 = vmatmul.f32.gmra.mxu1 %v1281_v23  ;;  %v1486_v46 = vmul.f32 %v1281_v23, %v3035_v52  ;;  %v1014_v15 = vpop.f32.mrf.mxu2  ;;  %v949_v23 = vpop.f32.mrf.mxu1 }
 0x252   :  { %v1285_v33 = vmul.f32 0.5, %v1284_v39 }
 0x253   :  { %v1216_v31 = vmax.f32 %v1200_v48, 0.0  ;;  %1540 = vmatmul.f32.gmra.mxu2 %v1486_v46 }
 0x254   :  { %v1135_v47 = vpop.f32.mrf.mxu0  ;;  %v1286_v12 = vsub.f32 1.5, %v1285_v33  ;;  %v1012_v33 = vadd.f32 %v1011_v22, %v946_v17  ;;  %v1187_v22 = vmul.f32 %v3138_v36, %v3138_v36 }
 0x255   :  { %v1713_v44 = vpop.eup %1712  ;;  %v1232_v2 = vadd.f32 1e-05, %v1216_v31  ;;  %v1136_v45 = vadd.f32 %v1135_v47, %v1071_v40 }
 0x256   :  { %v1293_v51 = vmul.f32 %v1713_v44, %v1231_v28  ;;  %v1287_v4 = vmul.f32 %v1711_v60, %v1286_v12  ;;  %vm1299_vm15 = vweird.f32 %v1713_v44  ;;  %v1077_v12 = vadd.f32 %v1076_v30, %v1012_v33 }
 0x257   :  { %1714 = vrsqrt.f32 %v1232_v2  ;;  %v1169_v52 = vmul.f32 0.03125, %v1136_v45  ;;  %vm1300_vm1 = vmor %vm1298_vm0, %vm1299_vm15  ;;  %vm1308_vm3 = vweird.f32 %v1232_v2 }
 0x258   :  { %v1291_v3 = vsel %vm1290_vm14, %v1711_v60, %v1287_v4  ;;  %v1294_v9 = vmul.f32 %v1713_v44, %v1293_v51  ;;  %v1079_v60 = vpop.f32.mrf.mxu3 }
 0x259   :  { %v1201_v7 = vsub.f32 %v1169_v52, %v1185_v25  ;;  %1446 = vmatmul.f32.gmra.mxu1 %v1291_v3  ;;  %v1487_v38 = vmul.f32 %v1291_v3, %v3054_v21  ;;  %v1017_v3 = vpop.f32.mrf.mxu2  ;;  %v952_v17 = vpop.f32.mrf.mxu1 }
 0x25a   :  { %v1295_v50 = vmul.f32 0.5, %v1294_v9  ;;  %v1018_v33 = vadd.f32 %v1017_v3, %v952_v17  ;;  %v1189_v3 = vmul.f32 %v3168_v43, %v3168_v43 }
 0x25b   :  { %v1217_v34 = vmax.f32 %v1201_v7, 0.0  ;;  %1543 = vmatmul.f32.gmra.mxu2 %v1487_v38  ;;  %v1015_v38 = vadd.f32 %v1014_v15, %v949_v23  ;;  %v1188_v15 = vmul.f32 %v3153_v29, %v3153_v29 }
 0x25c   :  { %v1138_v54 = vpop.f32.mrf.mxu0  ;;  %v1296_v1 = vsub.f32 1.5, %v1295_v50 }
 0x25d   :  { %v1715_v14 = vpop.eup %1714  ;;  %v1233_v39 = vadd.f32 1e-05, %v1217_v34  ;;  %v1139_v24 = vadd.f32 %v1138_v54, %v1074_v57  ;;  %v1080_v54 = vadd.f32 %v1079_v60, %v1015_v38 }
 0x25e   :  { %v1303_v48 = vmul.f32 %v1715_v14, %v1232_v2  ;;  %v1297_v46 = vmul.f32 %v1713_v44, %v1296_v1  ;;  %vm1309_vm2 = vweird.f32 %v1715_v14 }
 0x25f   :  { %1716 = vrsqrt.f32 %v1233_v39  ;;  %v1170_v21 = vmul.f32 0.03125, %v1139_v24  ;;  %vm1310_vm4 = vmor %vm1308_vm3, %vm1309_vm2  ;;  %vm1318_vm6 = vweird.f32 %v1233_v39 }
 0x260   :  { %v1301_v59 = vsel %vm1300_vm1, %v1713_v44, %v1297_v46  ;;  %v1304_v13 = vmul.f32 %v1715_v14, %v1303_v48  ;;  %v1082_v30 = vpop.f32.mrf.mxu3 }
 0x261   :  { %v1202_v40 = vsub.f32 %v1170_v21, %v1186_v35  ;;  %1449 = vmatmul.f32.gmra.mxu1 %v1301_v59  ;;  %v1488_v31 = vmul.f32 %v1301_v59, %v3071_v6 }
 0x262   :  { %v1305_v47 = vmul.f32 0.5, %v1304_v13  ;;  %v955_v13 = vpop.f32.mrf.mxu1 }
 0x263   :  { %v1218_v45 = vmax.f32 %v1202_v40, 0.0  ;;  %1546 = vmatmul.f32.gmra.mxu2 %v1488_v31 }
 0x264   :  { %v1141_v51 = vpop.f32.mrf.mxu0  ;;  %v1306_v4 = vsub.f32 1.5, %v1305_v47 }
 0x265   :  { %v1717_v28 = vpop.eup %1716  ;;  %v1234_v25 = vadd.f32 1e-05, %v1218_v45  ;;  %v1142_v52 = vadd.f32 %v1141_v51, %v1077_v12  ;;  %v1083_v45 = vadd.f32 %v1082_v30, %v1018_v33 }
 0x266   :  { %v1313_v9 = vmul.f32 %v1717_v28, %v1233_v39  ;;  %v1307_v20 = vmul.f32 %v1715_v14, %v1306_v4  ;;  %vm1319_vm5 = vweird.f32 %v1717_v28 }
 0x267   :  { %1718 = vrsqrt.f32 %v1234_v25  ;;  %v1171_v6 = vmul.f32 0.03125, %v1142_v52  ;;  %vm1320_vm7 = vmor %vm1318_vm6, %vm1319_vm5  ;;  %vm1328_vm9 = vweird.f32 %v1234_v25 }
 0x268   :  { %v1311_v44 = vsel %vm1310_vm4, %v1715_v14, %v1307_v20  ;;  %v1314_v7 = vmul.f32 %v1717_v28, %v1313_v9  ;;  %v1085_v47 = vpop.f32.mrf.mxu3 }
 0x269   :  { %v1203_v50 = vsub.f32 %v1171_v6, %v1187_v22  ;;  %1452 = vmatmul.f32.gmra.mxu1 %v1311_v44  ;;  %v1489_v57 = vmul.f32 %v1311_v44, %v3089_v62  ;;  %v1020_v62 = vpop.f32.mrf.mxu2 }
 0x26a   :  { %v1315_v34 = vmul.f32 0.5, %v1314_v7  ;;  %v1021_v30 = vadd.f32 %v1020_v62, %v955_v13 }
 0x26b   :  { %v1219_v1 = vmax.f32 %v1203_v50, 0.0  ;;  %1549 = vmatmul.f32.gmra.mxu2 %v1489_v57  ;;  %v958_v57 = vpop.f32.mrf.mxu1 }
 0x26c   :  { %v1144_v2 = vpop.f32.mrf.mxu0  ;;  %v1316_v24 = vsub.f32 1.5, %v1315_v34  ;;  %v1086_v34 = vadd.f32 %v1085_v47, %v1021_v30 }
 0x26d   :  { %v1719_v48 = vpop.eup %1718  ;;  %v1235_v46 = vadd.f32 1e-05, %v1219_v1  ;;  %v1145_v35 = vadd.f32 %v1144_v2, %v1080_v54 }
 0x26e   :  { %v1323_v21 = vmul.f32 %v1719_v48, %v1234_v25  ;;  %v1317_v59 = vmul.f32 %v1717_v28, %v1316_v24  ;;  %vm1329_vm8 = vweird.f32 %v1719_v48 }
 0x26f   :  { %1720 = vrsqrt.f32 %v1235_v46  ;;  %v1172_v14 = vmul.f32 0.03125, %v1145_v35  ;;  %vm1330_vm10 = vmor %vm1328_vm9, %vm1329_vm8  ;;  %vm1338_vm12 = vweird.f32 %v1235_v46 }
 0x270   :  { %v1321_v23 = vsel %vm1320_vm7, %v1717_v28, %v1317_v59  ;;  %v1324_v60 = vmul.f32 %v1719_v48, %v1323_v21  ;;  %v1088_v25 = vpop.f32.mrf.mxu3 }
 0x271   :  { %v1204_v40 = vsub.f32 %v1172_v14, %v1188_v15  ;;  %1455 = vmatmul.f32.gmra.mxu1 %v1321_v23  ;;  %v1490_v31 = vmul.f32 %v1321_v23, %v3106_v37  ;;  %v1023_v38 = vpop.f32.mrf.mxu2  ;;  %v1190_v15 = vmul.f32 %v3183_v55, %v3183_v55 }
 0x272   :  { %v1325_v12 = vmul.f32 0.5, %v1324_v60  ;;  %v1024_v23 = vadd.f32 %v1023_v38, %v958_v57 }
 0x273   :  { %v1220_v51 = vmax.f32 %v1204_v40, 0.0  ;;  %1552 = vmatmul.f32.gmra.mxu2 %v1490_v31 }
 0x274   :  { %v1147_v39 = vpop.f32.mrf.mxu0  ;;  %v1326_v4 = vsub.f32 1.5, %v1325_v12  ;;  %v1089_v40 = vadd.f32 %v1088_v25, %v1024_v23 }
 0x275   :  { %v1721_v52 = vpop.eup %1720  ;;  %v1236_v9 = vadd.f32 1e-05, %v1220_v51  ;;  %v1148_v20 = vadd.f32 %v1147_v39, %v1083_v45 }
 0x276   :  { %v1333_v22 = vmul.f32 %v1721_v52, %v1235_v46  ;;  %v1327_v28 = vmul.f32 %v1719_v48, %v1326_v4  ;;  %vm1339_vm11 = vweird.f32 %v1721_v52  ;;  %v961_v4 = vpop.f32.mrf.mxu1 }
 0x277   :  { %1722 = vrsqrt.f32 %v1236_v9  ;;  %v1173_v17 = vmul.f32 0.03125, %v1148_v20  ;;  %vm1340_vm13 = vmor %vm1338_vm12, %vm1339_vm11  ;;  %vm1348_vm15 = vweird.f32 %v1236_v9 }
 0x278   :  { %v1331_v37 = vsel %vm1330_vm10, %v1719_v48, %v1327_v28  ;;  %v1334_v6 = vmul.f32 %v1721_v52, %v1333_v22  ;;  %v1191_v28 = vmul.f32 %v3193_v58, %v3193_v58 }
 0x279   :  { %v1205_v44 = vsub.f32 %v1173_v17, %v1189_v3  ;;  %1458 = vmatmul.f32.gmra.mxu1 %v1331_v37  ;;  %v1491_v7 = vmul.f32 %v1331_v37, %v3123_v27  ;;  %v1026_v47 = vpop.f32.mrf.mxu2 }
 0x27a   :  { %v1335_v50 = vmul.f32 0.5, %v1334_v6  ;;  %v1027_v37 = vadd.f32 %v1026_v47, %v961_v4 }
 0x27b   :  { %v1221_v54 = vmax.f32 %v1205_v44, 0.0  ;;  %1555 = vmatmul.f32.gmra.mxu2 %v1491_v7 }
 0x27c   :  { %v1150_v1 = vpop.f32.mrf.mxu0  ;;  %v1336_v2 = vsub.f32 1.5, %v1335_v50 }
 0x27d   :  { %v1723_v24 = vpop.eup %1722  ;;  %v1237_v35 = vadd.f32 1e-05, %v1221_v54  ;;  %v1151_v21 = vadd.f32 %v1150_v1, %v1086_v34 }
 0x27e   :  { %v1343_v48 = vmul.f32 %v1723_v24, %v1236_v9  ;;  %v1337_v59 = vmul.f32 %v1721_v52, %v1336_v2  ;;  %vm1349_vm14 = vweird.f32 %v1723_v24 }
 0x27f   :  { %1724 = vrsqrt.f32 %v1237_v35  ;;  %v1174_v27 = vmul.f32 0.03125, %v1151_v21  ;;  %vm1350_vm0 = vmor %vm1348_vm15, %vm1349_vm14  ;;  %vm1358_vm2 = vweird.f32 %v1237_v35 }
 0x280   :  { %v1341_v14 = vsel %vm1340_vm13, %v1721_v52, %v1337_v59  ;;  %v1344_v62 = vmul.f32 %v1723_v24, %v1343_v48  ;;  %v1091_v52 = vpop.f32.mrf.mxu3 }
 0x281   :  { %v1206_v60 = vsub.f32 %v1174_v27, %v1190_v15  ;;  %1461 = vmatmul.f32.gmra.mxu1 %v1341_v14  ;;  %v1492_v13 = vmul.f32 %v1341_v14, %v3138_v36  ;;  %v1092_v7 = vadd.f32 %v1091_v52, %v1027_v37  ;;  %v1029_v25 = vpop.f32.mrf.mxu2 }
 0x282   :  { %v1345_v33 = vmul.f32 0.5, %v1344_v62 }
 0x283   :  { %v1222_v31 = vmax.f32 %v1206_v60, 0.0  ;;  %1558 = vmatmul.f32.gmra.mxu2 %v1492_v13 }
 0x284   :  { %v1153_v12 = vpop.f32.mrf.mxu0  ;;  %v1346_v46 = vsub.f32 1.5, %v1345_v33 }
 0x285   :  { %v1725_v45 = vpop.eup %1724  ;;  %v1238_v51 = vadd.f32 1e-05, %v1222_v31  ;;  %v1154_v39 = vadd.f32 %v1153_v12, %v1089_v40 }
 0x286   :  { %v1353_v20 = vmul.f32 %v1725_v45, %v1237_v35  ;;  %v1347_v22 = vmul.f32 %v1723_v24, %v1346_v46  ;;  %vm1359_vm1 = vweird.f32 %v1725_v45 }
 0x287   :  { %1726 = vrsqrt.f32 %v1238_v51  ;;  %v1175_v36 = vmul.f32 0.03125, %v1154_v39  ;;  %vm1360_vm3 = vmor %vm1358_vm2, %vm1359_vm1  ;;  %vm1368_vm5 = vweird.f32 %v1238_v51 }
 0x288   :  { %v1351_v3 = vsel %vm1350_vm0, %v1723_v24, %v1347_v22  ;;  %v1354_v17 = vmul.f32 %v1725_v45, %v1353_v20  ;;  %v1192_v24 = vmul.f32 %v3197_v16, %v3197_v16  ;;  %v1094_v48 = vpop.f32.mrf.mxu3  ;;  %vm1632_vm0 = vcmask 130048  }
 0x289   :  { %v1207_v6 = vsub.f32 %v1175_v36, %v1191_v28  ;;  %1464 = vmatmul.f32.gmra.mxu1 %v1351_v3  ;;  %v1493_v30 = vmul.f32 %v1351_v3, %v3153_v29  ;;  %v964_v29 = vpop.f32.mrf.mxu1 }
 0x28a   :  { %v1355_v44 = vmul.f32 0.5, %v1354_v17  ;;  %v1030_v27 = vadd.f32 %v1029_v25, %v964_v29 }
 0x28b   :  { %v1223_v38 = vmax.f32 %v1207_v6, 0.0  ;;  %1561 = vmatmul.f32.gmra.mxu2 %v1493_v30 }
 0x28c   :  { %v1156_v50 = vpop.f32.mrf.mxu0  ;;  %v1356_v57 = vsub.f32 1.5, %v1355_v44  ;;  %v1095_v60 = vadd.f32 %v1094_v48, %v1030_v27  ;;  %v3290_v48 = vld [vmem:[%s3394_s7] ss:$0 sm:$0xff] }
 0x28d   :  { %v1727_v9 = vpop.eup %1726  ;;  %v1239_v34 = vadd.f32 1e-05, %v1223_v38  ;;  %v1157_v54 = vadd.f32 %v1156_v50, %v1092_v7 }
 0x28e   :  { %v1363_v1 = vmul.f32 %v1727_v9, %v1238_v51  ;;  %v1357_v2 = vmul.f32 %v1725_v45, %v1356_v57  ;;  %vm1369_vm4 = vweird.f32 %v1727_v9 }
 0x28f   :  { %1728 = vrsqrt.f32 %v1239_v34  ;;  %v1176_v21 = vmul.f32 0.03125, %v1157_v54  ;;  %vm1370_vm6 = vmor %vm1368_vm5, %vm1369_vm4  ;;  %vm1378_vm8 = vweird.f32 %v1239_v34 }
 0x290   :  { %v1361_v59 = vsel %vm1360_vm3, %v1725_v45, %v1357_v2  ;;  %v1364_v15 = vmul.f32 %v1727_v9, %v1363_v1  ;;  %v1193_v45 = vmul.f32 %v3204_v19, %v3204_v19 }
 0x291   :  { %v1208_v14 = vsub.f32 %v1176_v21, %v1192_v24  ;;  %1467 = vmatmul.f32.gmra.mxu1 %v1361_v59  ;;  %v1494_v62 = vmul.f32 %v1361_v59, %v3168_v43 }
 0x292   :  { %v1365_v23 = vmul.f32 0.5, %v1364_v15 }
 0x293   :  { %v1224_v13 = vmax.f32 %v1208_v14, 0.0  ;;  %1564 = vmatmul.f32.gmra.mxu2 %v1494_v62 }
 0x294   :  { %v1159_v35 = vpop.f32.mrf.mxu0  ;;  %v1366_v33 = vsub.f32 1.5, %v1365_v23 }
 0x295   :  { %v1729_v40 = vpop.eup %1728  ;;  %v1240_v31 = vadd.f32 1e-05, %v1224_v13  ;;  %v1160_v47 = vadd.f32 %v1159_v35, %v1095_v60 }
 0x296   :  { %v1373_v12 = vmul.f32 %v1729_v40, %v1239_v34  ;;  %v1367_v46 = vmul.f32 %v1727_v9, %v1366_v33  ;;  %vm1379_vm7 = vweird.f32 %v1729_v40 }
 0x297   :  { %1730 = vrsqrt.f32 %v1240_v31  ;;  %v1177_v39 = vmul.f32 0.03125, %v1160_v47  ;;  %vm1380_vm9 = vmor %vm1378_vm8, %vm1379_vm7  ;;  %vm1388_vm11 = vweird.f32 %v1240_v31 }
 0x298   :  { %v1371_v43 = vsel %vm1370_vm6, %v1727_v9, %v1367_v46  ;;  %v1374_v4 = vmul.f32 %v1729_v40, %v1373_v12 }
 0x299   :  { %v1209_v20 = vsub.f32 %v1177_v39, %v1193_v45  ;;  %1470 = vmatmul.f32.gmra.mxu1 %v1371_v43  ;;  %v1495_v52 = vmul.f32 %v1371_v43, %v3183_v55 }
 0x29a   :  { %v1375_v22 = vmul.f32 0.5, %v1374_v4 }
 0x29b   :  { %v1225_v28 = vmax.f32 %v1209_v20, 0.0  ;;  %1567 = vmatmul.f32.gmra.mxu2 %v1495_v52 }
 0x29c   :  { %v1376_v36 = vsub.f32 1.5, %v1375_v22 }
 0x29d   :  { %v1731_v3 = vpop.eup %1730  ;;  %v1241_v17 = vadd.f32 1e-05, %v1225_v28 }
 0x29e   :  { %v1383_v51 = vmul.f32 %v1731_v3, %v1240_v31  ;;  %v1377_v37 = vmul.f32 %v1729_v40, %v1376_v36  ;;  %vm1389_vm10 = vweird.f32 %v1731_v3 }
 0x29f   :  { %1732 = vrsqrt.f32 %v1241_v17  ;;  %vm1390_vm12 = vmor %vm1388_vm11, %vm1389_vm10  ;;  %vm1398_vm14 = vweird.f32 %v1241_v17 }
 0x2a0   :  { %v1381_v6 = vsel %vm1380_vm9, %v1729_v40, %v1377_v37  ;;  %v1384_v30 = vmul.f32 %v1731_v3, %v1383_v51 }
 0x2a1   :  { %1473 = vmatmul.f32.gmra.mxu1 %v1381_v6  ;;  %v1496_v44 = vmul.f32 %v1381_v6, %v3193_v58 }
 0x2a2   :  { %v1385_v7 = vmul.f32 0.5, %v1384_v30 }
 0x2a3   :  { %1570 = vmatmul.f32.gmra.mxu2 %v1496_v44 }
 0x2a4   :  { %v1386_v55 = vsub.f32 1.5, %v1385_v7 }
 0x2a5   :  { %v1733_v38 = vpop.eup %1732 }
 0x2a6   :  { %v1393_v50 = vmul.f32 %v1733_v38, %v1241_v17  ;;  %v1387_v57 = vmul.f32 %v1731_v3, %v1386_v55  ;;  %vm1399_vm13 = vweird.f32 %v1733_v38 }
 0x2a7   :  { %vm1400_vm15 = vmor %vm1398_vm14, %vm1399_vm13 }
 0x2a8   :  { %v1391_v9 = vsel %vm1390_vm12, %v1731_v3, %v1387_v57  ;;  %v1394_v54 = vmul.f32 %v1733_v38, %v1393_v50 }
 0x2a9   :  { %1476 = vmatmul.f32.gmra.mxu1 %v1391_v9  ;;  %v1497_v34 = vmul.f32 %v1391_v9, %v3197_v16 }
 0x2aa   :  { %v1395_v25 = vmul.f32 0.5, %v1394_v54 }
 0x2ab   :  { %1573 = vmatmul.f32.gmra.mxu2 %v1497_v34 }
 0x2ac   :  { %v1396_v1 = vsub.f32 1.5, %v1395_v25 }
 0x2ae   :  { %v1397_v2 = vmul.f32 %v1733_v38, %v1396_v1 }
 0x2b0   :  { %v1401_v58 = vsel %vm1400_vm15, %v1733_v38, %v1397_v2 }
 0x2b1   :  { %1479 = vmatmul.f32.gmra.mxu1 %v1401_v58  ;;  %v1498_v24 = vmul.f32 %v1401_v58, %v3204_v19 }
 0x2b3   :  { %1576 = vmatmul.f32.gmra.mxu2 %v1498_v24 }
 0x2b6   :  { %v1435_v21 = vpop.f32.mrf.mxu1 }
 0x2b7   :  { %v1580_v29 = vmul.f32 %v1435_v21, %v2935_v49 }
 0x2be   :  { %v1438_v16 = vpop.f32.mrf.mxu1  ;;  %v1532_v59 = vpop.f32.mrf.mxu2 }
 0x2bf   :  { %v1596_v15 = vsub.f32 %v1580_v29, %v1532_v59  ;;  %v1581_v19 = vmul.f32 %v1438_v16, %v2952_v18 }
 0x2c1   :  { %v1616_v27 = vadd.f32 %v3290_v48, %v1596_v15 }
 0x2c3   :  { %1633 = vst.msk [vmem:[%s3395_s8] sm:$0xff] %vm1632_vm0, %v1616_v27 }
 0x2c6   :  { %v1441_v14 = vpop.f32.mrf.mxu1  ;;  %v1535_v49 = vpop.f32.mrf.mxu2 }
 0x2c7   :  { %v1597_v62 = vsub.f32 %v1581_v19, %v1535_v49  ;;  %v1582_v60 = vmul.f32 %v1441_v14, %v2969_v42 }
 0x2c9   :  { %v1617_v23 = vadd.f32 %v3290_v48, %v1597_v62 }
 0x2cb   :  { %1634 = vst.msk [vmem:[%s3395_s8 + $0x8] sm:$0xff] %vm1632_vm0, %v1617_v23 }
 0x2ce   :  { %v1444_v13 = vpop.f32.mrf.mxu1  ;;  %v1538_v35 = vpop.f32.mrf.mxu2 }
 0x2cf   :  { %v1598_v33 = vsub.f32 %v1582_v60, %v1538_v35  ;;  %v1583_v18 = vmul.f32 %v1444_v13, %v2991_v8 }
 0x2d1   :  { %v1618_v40 = vadd.f32 %v3290_v48, %v1598_v33 }
 0x2d3   :  { %1635 = vst.msk [vmem:[%s3395_s8 + $0x10] sm:$0xff] %vm1632_vm0, %v1618_v40 }
 0x2d6   :  { %v1447_v31 = vpop.f32.mrf.mxu1  ;;  %v1541_v47 = vpop.f32.mrf.mxu2 }
 0x2d7   :  { %v1599_v12 = vsub.f32 %v1583_v18, %v1541_v47  ;;  %v1584_v42 = vmul.f32 %v1447_v31, %v3012_v10 }
 0x2d9   :  { %v1619_v46 = vadd.f32 %v3290_v48, %v1599_v12 }
 0x2db   :  { %1636 = vst.msk [vmem:[%s3395_s8 + $0x18] sm:$0xff] %vm1632_vm0, %v1619_v46 }
 0x2de   :  { %v1450_v45 = vpop.f32.mrf.mxu1  ;;  %v1544_v39 = vpop.f32.mrf.mxu2 }
 0x2df   :  { %v1600_v43 = vsub.f32 %v1584_v42, %v1544_v39  ;;  %v1585_v8 = vmul.f32 %v1450_v45, %v3031_v61 }
 0x2e1   :  { %v1620_v4 = vadd.f32 %v3290_v48, %v1600_v43 }
 0x2e3   :  { %1637 = vst.msk [vmem:[%s3395_s8 + $0x20] sm:$0xff] %vm1632_vm0, %v1620_v4 }
 0x2e6   :  { %v1453_v20 = vpop.f32.mrf.mxu1  ;;  %v1547_v52 = vpop.f32.mrf.mxu2 }
 0x2e7   :  { %v1601_v22 = vsub.f32 %v1585_v8, %v1547_v52  ;;  %v1586_v10 = vmul.f32 %v1453_v20, %v3050_v53 }
 0x2e9   :  { %v1621_v28 = vadd.f32 %v3290_v48, %v1601_v22 }
 0x2eb   :  { %1638 = vst.msk [vmem:[%s3395_s8 + $0x28] sm:$0xff] %vm1632_vm0, %v1621_v28 }
 0x2ee   :  { %v1456_v36 = vpop.f32.mrf.mxu1  ;;  %v1550_v3 = vpop.f32.mrf.mxu2 }
 0x2ef   :  { %v1602_v17 = vsub.f32 %v1586_v10, %v1550_v3  ;;  %v1587_v61 = vmul.f32 %v1456_v36, %v3067_v56 }
 0x2f1   :  { %v1622_v51 = vadd.f32 %v3290_v48, %v1602_v17 }
 0x2f3   :  { %1639 = vst.msk [vmem:[%s3395_s8 + $0x30] sm:$0xff] %vm1632_vm0, %v1622_v51 }
 0x2f6   :  { %v1459_v37 = vpop.f32.mrf.mxu1  ;;  %v1553_v6 = vpop.f32.mrf.mxu2 }
 0x2f7   :  { %v1603_v30 = vsub.f32 %v1587_v61, %v1553_v6  ;;  %v1588_v53 = vmul.f32 %v1459_v37, %v3085_v32 }
 0x2f9   :  { %v1623_v44 = vadd.f32 %v3290_v48, %v1603_v30 }
 0x2fb   :  { %1640 = vst.msk [vmem:[%s3395_s8 + $0x38] sm:$0xff] %vm1632_vm0, %v1623_v44 }
 0x2fe   :  { %v1462_v7 = vpop.f32.mrf.mxu1  ;;  %v1556_v55 = vpop.f32.mrf.mxu2 }
 0x2ff   :  { %v1604_v38 = vsub.f32 %v1588_v53, %v1556_v55  ;;  %v1589_v56 = vmul.f32 %v1462_v7, %v3102_v11 }
 0x301   :  { %v1624_v50 = vadd.f32 %v3290_v48, %v1604_v38 }
 0x303   :  { %1641 = vst.msk [vmem:[%s3395_s8 + $0x40] sm:$0xff] %vm1632_vm0, %v1624_v50 }
 0x306   :  { %v1465_v57 = vpop.f32.mrf.mxu1  ;;  %v1559_v9 = vpop.f32.mrf.mxu2 }
 0x307   :  { %v1605_v54 = vsub.f32 %v1589_v56, %v1559_v9  ;;  %v1590_v32 = vmul.f32 %v1465_v57, %v3119_v5 }
 0x309   :  { %v1625_v34 = vadd.f32 %v3290_v48, %v1605_v54 }
 0x30b   :  { %1642 = vst.msk [vmem:[%s3395_s8 + $0x48] sm:$0xff] %vm1632_vm0, %v1625_v34 }
 0x30e   :  { %v1468_v25 = vpop.f32.mrf.mxu1  ;;  %v1562_v1 = vpop.f32.mrf.mxu2 }
 0x30f   :  { %v1606_v2 = vsub.f32 %v1590_v32, %v1562_v1  ;;  %v1591_v11 = vmul.f32 %v1468_v25, %v3134_v63 }
 0x311   :  { %v1626_v58 = vadd.f32 %v3290_v48, %v1606_v2 }
 0x313   :  { %1643 = vst.msk [vmem:[%s3395_s8 + $0x50] sm:$0xff] %vm1632_vm0, %v1626_v58 }
 0x316   :  { %v1471_v24 = vpop.f32.mrf.mxu1  ;;  %v1565_v21 = vpop.f32.mrf.mxu2 }
 0x317   :  { %v1607_v29 = vsub.f32 %v1591_v11, %v1565_v21  ;;  %v1592_v5 = vmul.f32 %v1471_v24, %v3149_v41 }
 0x319   :  { %v1627_v16 = vadd.f32 %v3290_v48, %v1607_v29 }
 0x31b   :  { %1644 = vst.msk [vmem:[%s3395_s8 + $0x58] sm:$0xff] %vm1632_vm0, %v1627_v16 }
 0x31e   :  { %v1474_v59 = vpop.f32.mrf.mxu1  ;;  %v1568_v15 = vpop.f32.mrf.mxu2 }
 0x31f   :  { %v1608_v27 = vsub.f32 %v1592_v5, %v1568_v15  ;;  %v1593_v63 = vmul.f32 %v1474_v59, %v3164_v26  ;;  %v3430_v26 = vld [vmem:[#allocation3_spill] sm:$0xff] }
 0x321   :  { %v1628_v19 = vadd.f32 %v3290_v48, %v1608_v27 }
 0x323   :  { %1645 = vst.msk [vmem:[%s3395_s8 + $0x60] sm:$0xff] %vm1632_vm0, %v1628_v19 }
 0x326   :  { %v1571_v14 = vpop.f32.mrf.mxu2  ;;  %v1477_v62 = vpop.f32.mrf.mxu1 }
 0x327   :  { %v1609_v49 = vsub.f32 %v1593_v63, %v1571_v14  ;;  %v1594_v41 = vmul.f32 %v1477_v62, %v3179_v0 }
 0x329   :  { %v1629_v23 = vadd.f32 %v3290_v48, %v1609_v49 }
 0x32b   :  { %1646 = vst.msk [vmem:[%s3395_s8 + $0x68] sm:$0xff] %vm1632_vm0, %v1629_v23 }
 0x32e   :  { %v1574_v60 = vpop.f32.mrf.mxu2  ;;  %v1480_v33 = vpop.f32.mrf.mxu1 }
 0x32f   :  { %v1610_v13 = vsub.f32 %v1594_v41, %v1574_v60  ;;  %v1595_v40 = vmul.f32 %v1480_v33, %v3430_v26 }
 0x331   :  { %v1630_v35 = vadd.f32 %v3290_v48, %v1610_v13 }
 0x333   :  { %1647 = vst.msk [vmem:[%s3395_s8 + $0x70] sm:$0xff] %vm1632_vm0, %v1630_v35 }
 0x336   :  { %v1577_v18 = vpop.f32.mrf.mxu2 }
 0x337   :  { %v1611_v31 = vsub.f32 %v1595_v40, %v1577_v18 }
 0x339   :  { %v1631_v47 = vadd.f32 %v3290_v48, %v1611_v31 }
 0x33b   :  { %1648 = vst.msk [vmem:[%s3395_s8 + $0x78] sm:$0xff] %vm1632_vm0, %v1631_v47 }

</bundles_post_ra>
